<compile_context>
chip_gen: v7x
topology: tpu7x:2x2x1
jax: 0.10.0
libtpu: 0.0.40
codegen_flags: <defaults>
</compile_context>

<pallas_src>
import functools

import jax
import jax.numpy as jnp
from jax import lax
from jax.experimental import pallas as pl
from jax.experimental.pallas import tpu as pltpu


# ----------------------------------------------------------------------------
# Fused decoder kernel: one grid step == one batch element, full T-step decode.
# ----------------------------------------------------------------------------
def _gru_decoder_kernel(
    # ---- inputs (VMEM refs) ----
    e_all_ref,                  # (L, H)   encoder states ("keys") for this batch element
    h0_ref,                     # (1, H)   initial hidden state (= e_last for this element)
    wa_ref, ba_ref,             # (H, H), (1, H)     Wa (pre-transposed), bias
    ua_ref, bu_ref,             # (H, H), (1, H)     Ua (pre-transposed), bias
    va_ref, bv_ref,             # (1, H), (1, 1)     Va as a row vector, bias
    wih_ctx_ref,                # (3, H, H)  per-gate GRU input weights (context part)
    wih_in_ref,                 # (3, 3, H)  per-gate GRU input weights (d_input part)
    bih_ref,                    # (3, 1, H)
    whh_ref,                    # (3, H, H)  per-gate GRU hidden weights
    bhh_ref,                    # (3, 1, H)
    wo_ref, bo_ref,             # (H, 3), (1, 3)     output head
    # ---- outputs ----
    dout_ref,                   # (T, 3)   d_outputs for this batch element
    hfin_ref,                   # (1, H)   final hidden state
    attn_ref,                   # (T, L)   cross-attention distributions
    # ---- scratch ----
    h_sc,                       # (1, H)   recurrent hidden state
    din_sc,                     # (1, 3)   autoregressive d_input
    uak_sc,                     # (L, H)   loop-invariant Ua(keys)
    *,
    num_steps,
):
    f32 = jnp.float32
    keys = e_all_ref[...]                                           # (L, H)

    # Loop-invariant precompute (hoisted out of the time loop): Ua @ keys + b_u.
    uak_sc[...] = jnp.dot(keys, ua_ref[...], preferred_element_type=f32) + bu_ref[...]
    h_sc[...] = h0_ref[...]
    din_sc[...] = jnp.zeros(din_sc.shape, din_sc.dtype)

    @pl.loop(0, num_steps)
    def _step(i):
        h = h_sc[...]                                               # (1, H)
        d_in = din_sc[...]                                          # (1, 3)

        # ---------------- NN_Attention (additive attention) ----------------
        wa_q = jnp.dot(h, wa_ref[...], preferred_element_type=f32) + ba_ref[...]
        s = jnp.tanh(wa_q + uak_sc[...])                            # (L, H) broadcast
        # scores[l] = sum_h Va[h] * s[l, h]  ->  (1, L) row, no transposes
        scores = lax.dot_general(
            va_ref[...], s, (((1,), (1,)), ((), ())),
            preferred_element_type=f32) + bv_ref[...]               # (1, L)
        m = jnp.max(scores, axis=-1, keepdims=True)
        e = jnp.exp(scores - m)
        w = e * pl.reciprocal(jnp.sum(e, axis=-1, keepdims=True), approx=True)
        context = jnp.dot(w, keys, preferred_element_type=f32)      # (1, H)

        # ---------------- GRU cell (PyTorch gate order: r, z, n) ----------------
        def gate(g):
            gi = (jnp.dot(context, wih_ctx_ref[g], preferred_element_type=f32)
                  + jnp.dot(d_in, wih_in_ref[g], preferred_element_type=f32)
                  + bih_ref[g])
            gh = jnp.dot(h, whh_ref[g], preferred_element_type=f32) + bhh_ref[g]
            return gi, gh

        gi_r, gh_r = gate(0)
        gi_z, gh_z = gate(1)
        gi_n, gh_n = gate(2)
        r = jax.nn.sigmoid(gi_r + gh_r)
        z = jax.nn.sigmoid(gi_z + gh_z)
        n = jnp.tanh(gi_n + r * gh_n)                               # b_hn inside r*(.)
        h_new = (1.0 - z) * n + z * h

        # ---------------- output head ----------------
        out = jnp.dot(h_new, wo_ref[...], preferred_element_type=f32) + bo_ref[...]

        # Store this timestep's outputs (VMEM stores; HBM writeback once per grid step).
        dout_ref[pl.ds(i, 1), :] = out                              # (1, 3)
        attn_ref[pl.ds(i, 1), :] = w                                # (1, L)

        # Carry recurrent state.
        h_sc[...] = h_new
        # TODO(synk): teacher forcing (target is not None) would read target[:, i, :]
        # here instead of feeding back the prediction; only the target=None path is
        # implemented in-kernel. Dropout on d_input is identity in eval mode.
        din_sc[...] = out

    hfin_ref[...] = h_sc[...]


# ----------------------------------------------------------------------------
# Wrapper: repack PyTorch-layout weights and launch the single fused kernel.
# ----------------------------------------------------------------------------
def gru_decoder_forward(params, e_all, e_last, longest_coor):
    """params are in PyTorch layout (see gru_decoder_reference).
    Returns (d_outputs (B,T,3), d_hidden (1,B,H), cross_attn (B,T,L))."""
    B, L, H = e_all.shape
    T = int(longest_coor)
    OUT = params["W_out"].shape[0]          # = 3 for this module
    f32 = jnp.float32

    # ---- repack weights into the kernel layout (done once, outside the kernel) ----
    wa_t = params["Wa"].T                   # (H, H)   so that x @ Wa.T
    ba = params["ba"].reshape(1, H)
    ua_t = params["Ua"].T                   # (H, H)
    bu = params["bu"].reshape(1, H)
    va = params["Va"].reshape(1, H)         # Va as a row vector
    bv = params["bv"].reshape(1, 1)

    wih_t = params["W_ih"].T                # (H+3, 3H), input features = [context | d_input]
    whh_t = params["W_hh"].T                # (H, 3H)
    wih_ctx = jnp.stack([wih_t[:H, g * H:(g + 1) * H] for g in range(3)])   # (3, H, H)
    wih_in = jnp.stack([wih_t[H:, g * H:(g + 1) * H] for g in range(3)])    # (3, 3, H)
    bih = jnp.stack([params["b_ih"][g * H:(g + 1) * H].reshape(1, H) for g in range(3)])
    whh = jnp.stack([whh_t[:, g * H:(g + 1) * H] for g in range(3)])        # (3, H, H)
    bhh = jnp.stack([params["b_hh"][g * H:(g + 1) * H].reshape(1, H) for g in range(3)])

    wo_t = params["W_out"].T                # (H, OUT)
    bo = params["b_out"].reshape(1, OUT)

    h0 = jnp.transpose(e_last, (1, 0, 2))   # (1, B, H) -> (B, 1, H)

    const2 = lambda b: (0, 0)
    const3 = lambda b: (0, 0, 0)

    kernel = functools.partial(_gru_decoder_kernel, num_steps=T)
    d_outputs, h_fin, cross_attn = pl.pallas_call(
        kernel,
        out_shape=(
            jax.ShapeDtypeStruct((B, T, OUT), f32),
            jax.ShapeDtypeStruct((B, 1, H), f32),
            jax.ShapeDtypeStruct((B, T, L), f32),
        ),
        grid=(B,),
        in_specs=[
            pl.BlockSpec((None, L, H), lambda b: (b, 0, 0)),   # e_all (per batch element)
            pl.BlockSpec((None, 1, H), lambda b: (b, 0, 0)),   # h0
            pl.BlockSpec((H, H), const2),                      # Wa^T      (VMEM-resident)
            pl.BlockSpec((1, H), const2),                      # b_a
            pl.BlockSpec((H, H), const2),                      # Ua^T
            pl.BlockSpec((1, H), const2),                      # b_u
            pl.BlockSpec((1, H), const2),                      # Va row
            pl.BlockSpec((1, 1), const2),                      # b_v
            pl.BlockSpec((3, H, H), const3),                   # W_ih (context part, per gate)
            pl.BlockSpec((3, 3, H), const3),                   # W_ih (d_input part, per gate)
            pl.BlockSpec((3, 1, H), const3),                   # b_ih per gate
            pl.BlockSpec((3, H, H), const3),                   # W_hh per gate
            pl.BlockSpec((3, 1, H), const3),                   # b_hh per gate
            pl.BlockSpec((H, OUT), const2),                    # W_out^T
            pl.BlockSpec((1, OUT), const2),                    # b_out
        ],
        out_specs=(
            pl.BlockSpec((None, T, OUT), lambda b: (b, 0, 0)),
            pl.BlockSpec((None, 1, H), lambda b: (b, 0, 0)),
            pl.BlockSpec((None, T, L), lambda b: (b, 0, 0)),
        ),
        scratch_shapes=[
            pltpu.VMEM((1, H), f32),        # recurrent hidden state
            pltpu.VMEM((1, OUT), f32),      # autoregressive d_input
            pltpu.VMEM((L, H), f32),        # loop-invariant Ua(keys)
        ],
        compiler_params=pltpu.CompilerParams(
            dimension_semantics=("parallel",)),   # batch axis: megacore-shardable
    )(e_all, h0, wa_t, ba, ua_t, bu, va, bv,
      wih_ctx, wih_in, bih, whh, bhh, wo_t, bo)

    d_hidden = jnp.transpose(h_fin, (1, 0, 2))   # (B, 1, H) -> (1, B, H)
    return d_outputs, d_hidden, cross_attn


# ----------------------------------------------------------------------------
# Pure-JAX reference (PyTorch-faithful, eval mode, target=None)
# ----------------------------------------------------------------------------
def gru_decoder_reference(params, e_all, e_last, longest_coor):
    B, L, H = e_all.shape
    Wa, ba = params["Wa"], params["ba"]
    Ua, bu = params["Ua"], params["bu"]
    Va, bv = params["Va"], params["bv"]
    W_ih, b_ih = params["W_ih"], params["b_ih"]
    W_hh, b_hh = params["W_hh"], params["b_hh"]
    W_out, b_out = params["W_out"], params["b_out"]
    OUT = W_out.shape[0]

    h = e_last[0]                                    # (B, H)
    d_in = jnp.zeros((B, OUT), jnp.float32)
    outs, attns = [], []
    for _ in range(longest_coor):
        wa_q = h @ Wa.T + ba                         # (B, H)
        ua_k = e_all @ Ua.T + bu                     # (B, L, H)
        s = jnp.tanh(wa_q[:, None, :] + ua_k)        # (B, L, H)
        scores = (s @ Va.T + bv)[..., 0]             # (B, L)
        w = jax.nn.softmax(scores, axis=-1)          # (B, L)
        context = jnp.einsum("bl,blh->bh", w, e_all)
        x = jnp.concatenate([context, d_in], axis=-1)
        gi = x @ W_ih.T + b_ih
        gh = h @ W_hh.T + b_hh
        r = jax.nn.sigmoid(gi[:, :H] + gh[:, :H])
        z = jax.nn.sigmoid(gi[:, H:2 * H] + gh[:, H:2 * H])
        n = jnp.tanh(gi[:, 2 * H:] + r * gh[:, 2 * H:])
        h = (1.0 - z) * n + z * h
        out = h @ W_out.T + b_out                    # (B, OUT)
        outs.append(out[:, None, :])
        attns.append(w[:, None, :])
        d_in = out
    return (jnp.concatenate(outs, axis=1), h[None, :, :],
            jnp.concatenate(attns, axis=1))


# ----------------------------------------------------------------------------
# main
# ----------------------------------------------------------------------------
if __name__ == "__main__":
    B, L, H, T, OUT = 2, 8, 32, 8, 3

    key = jax.random.PRNGKey(0)
    ks = jax.random.split(key, 16)

    def lin_init(kw, kb, din, dout):
        bound = 1.0 / (din ** 0.5)
        w = jax.random.uniform(kw, (dout, din), jnp.float32, -bound, bound)
        b = jax.random.uniform(kb, (dout,), jnp.float32, -bound, bound)
        return w, b

    Wa, ba = lin_init(ks[0], ks[1], H, H)            # NN_Attention.Wa
    Ua, bu = lin_init(ks[2], ks[3], H, H)            # NN_Attention.Ua
    Va, bv = lin_init(ks[4], ks[5], H, 1)            # NN_Attention.Va
    gb = 1.0 / (H ** 0.5)                            # nn.GRU default init bound
    W_ih = jax.random.uniform(ks[6], (3 * H, H + OUT), jnp.float32, -gb, gb)
    W_hh = jax.random.uniform(ks[7], (3 * H, H), jnp.float32, -gb, gb)
    b_ih = jax.random.uniform(ks[8], (3 * H,), jnp.float32, -gb, gb)
    b_hh = jax.random.uniform(ks[9], (3 * H,), jnp.float32, -gb, gb)
    W_out, b_out = lin_init(ks[10], ks[11], H, OUT)  # GRU.out

    params = dict(Wa=Wa, ba=ba, Ua=Ua, bu=bu, Va=Va, bv=bv,
                  W_ih=W_ih, b_ih=b_ih, W_hh=W_hh, b_hh=b_hh,
                  W_out=W_out, b_out=b_out)

    e_all = jax.random.normal(ks[12], (B, L, H), jnp.float32)    # encoder states
    e_last = jax.random.normal(ks[13], (1, B, H), jnp.float32)   # initial hidden

    d_out, d_hid, attn = gru_decoder_forward(params, e_all, e_last, T)
    jax.block_until_ready((d_out, d_hid, attn))

    d_out_r, d_hid_r, attn_r = gru_decoder_reference(params, e_all, e_last, T)

    assert d_out.shape == (B, T, OUT)
    assert d_hid.shape == (1, B, H)
    assert attn.shape == (B, T, L)
    # Tolerance 2e-3: the only approximation vs. the reference is the EUP
    # approximate reciprocal in the softmax normalisation (per perf feedback).
    assert jnp.allclose(d_out, d_out_r, atol=2e-3, rtol=2e-3), \
        float(jnp.max(jnp.abs(d_out - d_out_r)))
    assert jnp.allclose(d_hid, d_hid_r, atol=2e-3, rtol=2e-3), \
        float(jnp.max(jnp.abs(d_hid - d_hid_r)))
    assert jnp.allclose(attn, attn_r, atol=2e-3, rtol=2e-3), \
        float(jnp.max(jnp.abs(attn - attn_r)))

    print("KERNEL_OK")
</pallas_src>

<mosaic_0001>
module attributes {stable_mosaic.version = 11 : i64} {
  func.func @_gru_decoder_kernel(%arg0: i32, %arg1: memref<1x8x32xf32, #tpu.memory_space<vmem>>, %arg2: memref<1x1x32xf32, #tpu.memory_space<vmem>>, %arg3: memref<32x32xf32, #tpu.memory_space<vmem>>, %arg4: memref<1x32xf32, #tpu.memory_space<vmem>>, %arg5: memref<32x32xf32, #tpu.memory_space<vmem>>, %arg6: memref<1x32xf32, #tpu.memory_space<vmem>>, %arg7: memref<1x32xf32, #tpu.memory_space<vmem>>, %arg8: memref<1x1xf32, #tpu.memory_space<vmem>>, %arg9: memref<3x32x32xf32, #tpu.memory_space<vmem>>, %arg10: memref<3x3x32xf32, #tpu.memory_space<vmem>>, %arg11: memref<3x1x32xf32, #tpu.memory_space<vmem>>, %arg12: memref<3x32x32xf32, #tpu.memory_space<vmem>>, %arg13: memref<3x1x32xf32, #tpu.memory_space<vmem>>, %arg14: memref<32x3xf32, #tpu.memory_space<vmem>>, %arg15: memref<1x3xf32, #tpu.memory_space<vmem>>, %arg16: memref<1x8x3xf32, #tpu.memory_space<vmem>>, %arg17: memref<1x1x32xf32, #tpu.memory_space<vmem>>, %arg18: memref<1x8x8xf32, #tpu.memory_space<vmem>>, %arg19: memref<1x32xf32, #tpu.memory_space<vmem>>, %arg20: memref<1x3xf32, #tpu.memory_space<vmem>>, %arg21: memref<8x32xf32, #tpu.memory_space<vmem>>) attributes {dimension_semantics = [#tpu.dimension_semantics<parallel>], iteration_bounds = array<i64: 2>, scalar_prefetch = 0 : i64, scratch_operands = 3 : i64, tpu.core_type = #tpu.core_type<tc>, window_params = [{transform_indices = @transform_0, window_bounds = array<i64: 1, 8, 32>}, {transform_indices = @transform_1, window_bounds = array<i64: 1, 1, 32>}, {pipeline_mode = #tpu.pipeline_mode<synchronous>, transform_indices = @transform_2, window_bounds = array<i64: 32, 32>}, {pipeline_mode = #tpu.pipeline_mode<synchronous>, transform_indices = @transform_3, window_bounds = array<i64: 1, 32>}, {pipeline_mode = #tpu.pipeline_mode<synchronous>, transform_indices = @transform_4, window_bounds = array<i64: 32, 32>}, {pipeline_mode = #tpu.pipeline_mode<synchronous>, transform_indices = @transform_5, window_bounds = array<i64: 1, 32>}, {pipeline_mode = #tpu.pipeline_mode<synchronous>, transform_indices = @transform_6, window_bounds = array<i64: 1, 32>}, {pipeline_mode = #tpu.pipeline_mode<synchronous>, transform_indices = @transform_7, window_bounds = array<i64: 1, 1>}, {pipeline_mode = #tpu.pipeline_mode<synchronous>, transform_indices = @transform_8, window_bounds = array<i64: 3, 32, 32>}, {pipeline_mode = #tpu.pipeline_mode<synchronous>, transform_indices = @transform_9, window_bounds = array<i64: 3, 3, 32>}, {pipeline_mode = #tpu.pipeline_mode<synchronous>, transform_indices = @transform_10, window_bounds = array<i64: 3, 1, 32>}, {pipeline_mode = #tpu.pipeline_mode<synchronous>, transform_indices = @transform_11, window_bounds = array<i64: 3, 32, 32>}, {pipeline_mode = #tpu.pipeline_mode<synchronous>, transform_indices = @transform_12, window_bounds = array<i64: 3, 1, 32>}, {pipeline_mode = #tpu.pipeline_mode<synchronous>, transform_indices = @transform_13, window_bounds = array<i64: 32, 3>}, {pipeline_mode = #tpu.pipeline_mode<synchronous>, transform_indices = @transform_14, window_bounds = array<i64: 1, 3>}, {transform_indices = @transform_15, window_bounds = array<i64: 1, 8, 3>}, {transform_indices = @transform_16, window_bounds = array<i64: 1, 1, 32>}, {transform_indices = @transform_17, window_bounds = array<i64: 1, 8, 8>}]} {
    %c0 = arith.constant 0 : index
    %c0_0 = arith.constant 0 : index
    %c0_1 = arith.constant 0 : index
    %0 = vector.load %arg1[%c0, %c0_0, %c0_1] : memref<1x8x32xf32, #tpu.memory_space<vmem>>, vector<1x8x32xf32>
    %1 = vector.shape_cast %0 : vector<1x8x32xf32> to vector<8x32xf32>
    %c0_2 = arith.constant 0 : index
    %c0_3 = arith.constant 0 : index
    %2 = vector.load %arg5[%c0_2, %c0_3] : memref<32x32xf32, #tpu.memory_space<vmem>>, vector<32x32xf32>
    %cst = arith.constant dense<0.000000e+00> : vector<8x32xf32>
    %3 = tpu.matmul %1, %2, %cst {dimension_numbers = #tpu.dot_dimension_numbers<[1], [0], [0], [1], [0, 0, 1, 1], [], []>} : vector<8x32xf32>, vector<32x32xf32>, vector<8x32xf32> -> vector<8x32xf32>
    %c0_4 = arith.constant 0 : index
    %c0_5 = arith.constant 0 : index
    %4 = vector.load %arg6[%c0_4, %c0_5] : memref<1x32xf32, #tpu.memory_space<vmem>>, vector<1x32xf32>
    %5 = vector.broadcast %4 : vector<1x32xf32> to vector<8x32xf32>
    %6 = arith.addf %3, %5 : vector<8x32xf32>
    %c0_6 = arith.constant 0 : index
    %c0_7 = arith.constant 0 : index
    %7 = vector.load %arg21[%c0_6, %c0_7] : memref<8x32xf32, #tpu.memory_space<vmem>>, vector<8x32xf32>
    tpu.vector_store %arg21[%c0_6, %c0_7], %6 {strides = array<i32>} : memref<8x32xf32, #tpu.memory_space<vmem>>, vector<8x32xf32>,
    %c0_8 = arith.constant 0 : index
    %c0_9 = arith.constant 0 : index
    %c0_10 = arith.constant 0 : index
    %8 = vector.load %arg2[%c0_8, %c0_9, %c0_10] : memref<1x1x32xf32, #tpu.memory_space<vmem>>, vector<1x1x32xf32>
    %9 = vector.shape_cast %8 : vector<1x1x32xf32> to vector<1x32xf32>
    %c0_11 = arith.constant 0 : index
    %c0_12 = arith.constant 0 : index
    %10 = vector.load %arg19[%c0_11, %c0_12] : memref<1x32xf32, #tpu.memory_space<vmem>>, vector<1x32xf32>
    tpu.vector_store %arg19[%c0_11, %c0_12], %9 {strides = array<i32>} : memref<1x32xf32, #tpu.memory_space<vmem>>, vector<1x32xf32>,
    %cst_13 = arith.constant 0.000000e+00 : f32
    %11 = vector.broadcast %cst_13 : f32 to vector<1x3xf32>
    %c0_14 = arith.constant 0 : index
    %c0_15 = arith.constant 0 : index
    %12 = vector.load %arg20[%c0_14, %c0_15] : memref<1x3xf32, #tpu.memory_space<vmem>>, vector<1x3xf32>
    tpu.vector_store %arg20[%c0_14, %c0_15], %11 {strides = array<i32>} : memref<1x3xf32, #tpu.memory_space<vmem>>, vector<1x3xf32>,
    %c0_i32 = arith.constant 0 : i32
    %c8_i32 = arith.constant 8 : i32
    %13 = arith.addi %c0_i32, %c8_i32 : i32
    %c1_i32 = arith.constant 1 : i32
    scf.for %arg22 = %c0_i32 to %13 step %c1_i32  : i32 {
      %c1_i32_22 = arith.constant 1 : i32
      %18 = arith.muli %arg22, %c1_i32_22 : i32
      %c0_i32_23 = arith.constant 0 : i32
      %19 = arith.addi %c0_i32_23, %18 : i32
      %c0_24 = arith.constant 0 : index
      %c0_25 = arith.constant 0 : index
      %20 = vector.load %arg19[%c0_24, %c0_25] : memref<1x32xf32, #tpu.memory_space<vmem>>, vector<1x32xf32>
      %c0_26 = arith.constant 0 : index
      %c0_27 = arith.constant 0 : index
      %21 = vector.load %arg20[%c0_26, %c0_27] : memref<1x3xf32, #tpu.memory_space<vmem>>, vector<1x3xf32>
      %c0_28 = arith.constant 0 : index
      %c0_29 = arith.constant 0 : index
      %22 = vector.load %arg3[%c0_28, %c0_29] : memref<32x32xf32, #tpu.memory_space<vmem>>, vector<32x32xf32>
      %cst_30 = arith.constant dense<0.000000e+00> : vector<1x32xf32>
      %23 = tpu.matmul %20, %22, %cst_30 {dimension_numbers = #tpu.dot_dimension_numbers<[1], [0], [0], [1], [0, 0, 1, 1], [], []>} : vector<1x32xf32>, vector<32x32xf32>, vector<1x32xf32> -> vector<1x32xf32>
      %c0_31 = arith.constant 0 : index
      %c0_32 = arith.constant 0 : index
      %24 = vector.load %arg4[%c0_31, %c0_32] : memref<1x32xf32, #tpu.memory_space<vmem>>, vector<1x32xf32>
      %25 = arith.addf %23, %24 : vector<1x32xf32>
      %c0_33 = arith.constant 0 : index
      %c0_34 = arith.constant 0 : index
      %26 = vector.load %arg21[%c0_33, %c0_34] : memref<8x32xf32, #tpu.memory_space<vmem>>, vector<8x32xf32>
      %27 = vector.broadcast %25 : vector<1x32xf32> to vector<8x32xf32>
      %28 = arith.addf %27, %26 : vector<8x32xf32>
      %29 = math.tanh %28 : vector<8x32xf32>
      %c0_35 = arith.constant 0 : index
      %c0_36 = arith.constant 0 : index
      %30 = vector.load %arg7[%c0_35, %c0_36] : memref<1x32xf32, #tpu.memory_space<vmem>>, vector<1x32xf32>
      %cst_37 = arith.constant dense<0.000000e+00> : vector<1x8xf32>
      %31 = tpu.matmul %30, %29, %cst_37 {dimension_numbers = #tpu.dot_dimension_numbers<[1], [1], [0], [0], [0, 0, 1, 0], [], []>} : vector<1x32xf32>, vector<8x32xf32>, vector<1x8xf32> -> vector<1x8xf32>
      %c0_38 = arith.constant 0 : index
      %c0_39 = arith.constant 0 : index
      %32 = vector.load %arg8[%c0_38, %c0_39] : memref<1x1xf32, #tpu.memory_space<vmem>>, vector<1x1xf32>
      %33 = vector.broadcast %32 : vector<1x1xf32> to vector<1x8xf32>
      %34 = arith.addf %31, %33 : vector<1x8xf32>
      %cst_40 = arith.constant dense<0xFF800000> : vector<1xf32>
      %35 = vector.multi_reduction <maximumf>, %34, %cst_40 [1] : vector<1x8xf32> to vector<1xf32>
      %36 = vector.shape_cast %35 : vector<1xf32> to vector<1x1xf32>
      %37 = vector.broadcast %36 : vector<1x1xf32> to vector<1x8xf32>
      %38 = arith.subf %34, %37 : vector<1x8xf32>
      %39 = math.exp %38 : vector<1x8xf32>
      %cst_41 = arith.constant dense<0.000000e+00> : vector<1xf32>
      %40 = vector.multi_reduction <add>, %39, %cst_41 [1] : vector<1x8xf32> to vector<1xf32>
      %41 = vector.shape_cast %40 : vector<1xf32> to vector<1x1xf32>
      %42 = tpu.reciprocal %41 {approx = true} : vector<1x1xf32> -> vector<1x1xf32>
      %43 = vector.broadcast %42 : vector<1x1xf32> to vector<1x8xf32>
      %44 = arith.mulf %39, %43 : vector<1x8xf32>
      %cst_42 = arith.constant dense<0.000000e+00> : vector<1x32xf32>
      %45 = tpu.matmul %44, %1, %cst_42 {dimension_numbers = #tpu.dot_dimension_numbers<[1], [0], [0], [1], [0, 0, 1, 1], [], []>} : vector<1x8xf32>, vector<8x32xf32>, vector<1x32xf32> -> vector<1x32xf32>
      %c0_43 = arith.constant 0 : index
      %c0_44 = arith.constant 0 : index
      %c0_45 = arith.constant 0 : index
      %46 = vector.load %arg9[%c0_43, %c0_44, %c0_45] : memref<3x32x32xf32, #tpu.memory_space<vmem>>, vector<1x32x32xf32>
      %47 = vector.shape_cast %46 : vector<1x32x32xf32> to vector<32x32xf32>
      %cst_46 = arith.constant dense<0.000000e+00> : vector<1x32xf32>
      %48 = tpu.matmul %45, %47, %cst_46 {dimension_numbers = #tpu.dot_dimension_numbers<[1], [0], [0], [1], [0, 0, 1, 1], [], []>} : vector<1x32xf32>, vector<32x32xf32>, vector<1x32xf32> -> vector<1x32xf32>
      %c0_47 = arith.constant 0 : index
      %c0_48 = arith.constant 0 : index
      %c0_49 = arith.constant 0 : index
      %49 = vector.load %arg10[%c0_47, %c0_48, %c0_49] : memref<3x3x32xf32, #tpu.memory_space<vmem>>, vector<1x3x32xf32>
      %50 = vector.shape_cast %49 : vector<1x3x32xf32> to vector<3x32xf32>
      %cst_50 = arith.constant dense<0.000000e+00> : vector<1x32xf32>
      %51 = tpu.matmul %21, %50, %cst_50 {dimension_numbers = #tpu.dot_dimension_numbers<[1], [0], [0], [1], [0, 0, 1, 1], [], []>} : vector<1x3xf32>, vector<3x32xf32>, vector<1x32xf32> -> vector<1x32xf32>
      %52 = arith.addf %48, %51 : vector<1x32xf32>
      %c0_51 = arith.constant 0 : index
      %c0_52 = arith.constant 0 : index
      %c0_53 = arith.constant 0 : index
      %53 = vector.load %arg11[%c0_51, %c0_52, %c0_53] : memref<3x1x32xf32, #tpu.memory_space<vmem>>, vector<1x1x32xf32>
      %54 = vector.shape_cast %53 : vector<1x1x32xf32> to vector<1x32xf32>
      %55 = arith.addf %52, %54 : vector<1x32xf32>
      %c0_54 = arith.constant 0 : index
      %c0_55 = arith.constant 0 : index
      %c0_56 = arith.constant 0 : index
      %56 = vector.load %arg12[%c0_54, %c0_55, %c0_56] : memref<3x32x32xf32, #tpu.memory_space<vmem>>, vector<1x32x32xf32>
      %57 = vector.shape_cast %56 : vector<1x32x32xf32> to vector<32x32xf32>
      %cst_57 = arith.constant dense<0.000000e+00> : vector<1x32xf32>
      %58 = tpu.matmul %20, %57, %cst_57 {dimension_numbers = #tpu.dot_dimension_numbers<[1], [0], [0], [1], [0, 0, 1, 1], [], []>} : vector<1x32xf32>, vector<32x32xf32>, vector<1x32xf32> -> vector<1x32xf32>
      %c0_58 = arith.constant 0 : index
      %c0_59 = arith.constant 0 : index
      %c0_60 = arith.constant 0 : index
      %59 = vector.load %arg13[%c0_58, %c0_59, %c0_60] : memref<3x1x32xf32, #tpu.memory_space<vmem>>, vector<1x1x32xf32>
      %60 = vector.shape_cast %59 : vector<1x1x32xf32> to vector<1x32xf32>
      %61 = arith.addf %58, %60 : vector<1x32xf32>
      %c1 = arith.constant 1 : index
      %c0_61 = arith.constant 0 : index
      %c0_62 = arith.constant 0 : index
      %62 = vector.load %arg9[%c1, %c0_61, %c0_62] : memref<3x32x32xf32, #tpu.memory_space<vmem>>, vector<1x32x32xf32>
      %63 = vector.shape_cast %62 : vector<1x32x32xf32> to vector<32x32xf32>
      %cst_63 = arith.constant dense<0.000000e+00> : vector<1x32xf32>
      %64 = tpu.matmul %45, %63, %cst_63 {dimension_numbers = #tpu.dot_dimension_numbers<[1], [0], [0], [1], [0, 0, 1, 1], [], []>} : vector<1x32xf32>, vector<32x32xf32>, vector<1x32xf32> -> vector<1x32xf32>
      %c1_64 = arith.constant 1 : index
      %c0_65 = arith.constant 0 : index
      %c0_66 = arith.constant 0 : index
      %65 = vector.load %arg10[%c1_64, %c0_65, %c0_66] : memref<3x3x32xf32, #tpu.memory_space<vmem>>, vector<1x3x32xf32>
      %66 = vector.shape_cast %65 : vector<1x3x32xf32> to vector<3x32xf32>
      %cst_67 = arith.constant dense<0.000000e+00> : vector<1x32xf32>
      %67 = tpu.matmul %21, %66, %cst_67 {dimension_numbers = #tpu.dot_dimension_numbers<[1], [0], [0], [1], [0, 0, 1, 1], [], []>} : vector<1x3xf32>, vector<3x32xf32>, vector<1x32xf32> -> vector<1x32xf32>
      %68 = arith.addf %64, %67 : vector<1x32xf32>
      %c1_68 = arith.constant 1 : index
      %c0_69 = arith.constant 0 : index
      %c0_70 = arith.constant 0 : index
      %69 = vector.load %arg11[%c1_68, %c0_69, %c0_70] : memref<3x1x32xf32, #tpu.memory_space<vmem>>, vector<1x1x32xf32>
      %70 = vector.shape_cast %69 : vector<1x1x32xf32> to vector<1x32xf32>
      %71 = arith.addf %68, %70 : vector<1x32xf32>
      %c1_71 = arith.constant 1 : index
      %c0_72 = arith.constant 0 : index
      %c0_73 = arith.constant 0 : index
      %72 = vector.load %arg12[%c1_71, %c0_72, %c0_73] : memref<3x32x32xf32, #tpu.memory_space<vmem>>, vector<1x32x32xf32>
      %73 = vector.shape_cast %72 : vector<1x32x32xf32> to vector<32x32xf32>
      %cst_74 = arith.constant dense<0.000000e+00> : vector<1x32xf32>
      %74 = tpu.matmul %20, %73, %cst_74 {dimension_numbers = #tpu.dot_dimension_numbers<[1], [0], [0], [1], [0, 0, 1, 1], [], []>} : vector<1x32xf32>, vector<32x32xf32>, vector<1x32xf32> -> vector<1x32xf32>
      %c1_75 = arith.constant 1 : index
      %c0_76 = arith.constant 0 : index
      %c0_77 = arith.constant 0 : index
      %75 = vector.load %arg13[%c1_75, %c0_76, %c0_77] : memref<3x1x32xf32, #tpu.memory_space<vmem>>, vector<1x1x32xf32>
      %76 = vector.shape_cast %75 : vector<1x1x32xf32> to vector<1x32xf32>
      %77 = arith.addf %74, %76 : vector<1x32xf32>
      %c2 = arith.constant 2 : index
      %c0_78 = arith.constant 0 : index
      %c0_79 = arith.constant 0 : index
      %78 = vector.load %arg9[%c2, %c0_78, %c0_79] : memref<3x32x32xf32, #tpu.memory_space<vmem>>, vector<1x32x32xf32>
      %79 = vector.shape_cast %78 : vector<1x32x32xf32> to vector<32x32xf32>
      %cst_80 = arith.constant dense<0.000000e+00> : vector<1x32xf32>
      %80 = tpu.matmul %45, %79, %cst_80 {dimension_numbers = #tpu.dot_dimension_numbers<[1], [0], [0], [1], [0, 0, 1, 1], [], []>} : vector<1x32xf32>, vector<32x32xf32>, vector<1x32xf32> -> vector<1x32xf32>
      %c2_81 = arith.constant 2 : index
      %c0_82 = arith.constant 0 : index
      %c0_83 = arith.constant 0 : index
      %81 = vector.load %arg10[%c2_81, %c0_82, %c0_83] : memref<3x3x32xf32, #tpu.memory_space<vmem>>, vector<1x3x32xf32>
      %82 = vector.shape_cast %81 : vector<1x3x32xf32> to vector<3x32xf32>
      %cst_84 = arith.constant dense<0.000000e+00> : vector<1x32xf32>
      %83 = tpu.matmul %21, %82, %cst_84 {dimension_numbers = #tpu.dot_dimension_numbers<[1], [0], [0], [1], [0, 0, 1, 1], [], []>} : vector<1x3xf32>, vector<3x32xf32>, vector<1x32xf32> -> vector<1x32xf32>
      %84 = arith.addf %80, %83 : vector<1x32xf32>
      %c2_85 = arith.constant 2 : index
      %c0_86 = arith.constant 0 : index
      %c0_87 = arith.constant 0 : index
      %85 = vector.load %arg11[%c2_85, %c0_86, %c0_87] : memref<3x1x32xf32, #tpu.memory_space<vmem>>, vector<1x1x32xf32>
      %86 = vector.shape_cast %85 : vector<1x1x32xf32> to vector<1x32xf32>
      %87 = arith.addf %84, %86 : vector<1x32xf32>
      %c2_88 = arith.constant 2 : index
      %c0_89 = arith.constant 0 : index
      %c0_90 = arith.constant 0 : index
      %88 = vector.load %arg12[%c2_88, %c0_89, %c0_90] : memref<3x32x32xf32, #tpu.memory_space<vmem>>, vector<1x32x32xf32>
      %89 = vector.shape_cast %88 : vector<1x32x32xf32> to vector<32x32xf32>
      %cst_91 = arith.constant dense<0.000000e+00> : vector<1x32xf32>
      %90 = tpu.matmul %20, %89, %cst_91 {dimension_numbers = #tpu.dot_dimension_numbers<[1], [0], [0], [1], [0, 0, 1, 1], [], []>} : vector<1x32xf32>, vector<32x32xf32>, vector<1x32xf32> -> vector<1x32xf32>
      %c2_92 = arith.constant 2 : index
      %c0_93 = arith.constant 0 : index
      %c0_94 = arith.constant 0 : index
      %91 = vector.load %arg13[%c2_92, %c0_93, %c0_94] : memref<3x1x32xf32, #tpu.memory_space<vmem>>, vector<1x1x32xf32>
      %92 = vector.shape_cast %91 : vector<1x1x32xf32> to vector<1x32xf32>
      %93 = arith.addf %90, %92 : vector<1x32xf32>
      %94 = arith.addf %55, %61 : vector<1x32xf32>
      %95 = arith.negf %94 : vector<1x32xf32>
      %96 = math.exp %95 : vector<1x32xf32>
      %cst_95 = arith.constant 1.000000e+00 : f32
      %97 = vector.broadcast %cst_95 : f32 to vector<1x32xf32>
      %98 = arith.addf %97, %96 : vector<1x32xf32>
      %99 = arith.divf %97, %98 : vector<1x32xf32>
      %100 = arith.addf %71, %77 : vector<1x32xf32>
      %101 = arith.negf %100 : vector<1x32xf32>
      %102 = math.exp %101 : vector<1x32xf32>
      %cst_96 = arith.constant 1.000000e+00 : f32
      %103 = vector.broadcast %cst_96 : f32 to vector<1x32xf32>
      %104 = arith.addf %103, %102 : vector<1x32xf32>
      %105 = arith.divf %103, %104 : vector<1x32xf32>
      %106 = arith.mulf %99, %93 : vector<1x32xf32>
      %107 = arith.addf %87, %106 : vector<1x32xf32>
      %108 = math.tanh %107 : vector<1x32xf32>
      %cst_97 = arith.constant 1.000000e+00 : f32
      %109 = vector.broadcast %cst_97 : f32 to vector<1x32xf32>
      %110 = arith.subf %109, %105 : vector<1x32xf32>
      %111 = arith.mulf %110, %108 : vector<1x32xf32>
      %112 = arith.mulf %105, %20 : vector<1x32xf32>
      %113 = arith.addf %111, %112 : vector<1x32xf32>
      %c0_98 = arith.constant 0 : index
      %c0_99 = arith.constant 0 : index
      %114 = vector.load %arg14[%c0_98, %c0_99] : memref<32x3xf32, #tpu.memory_space<vmem>>, vector<32x3xf32>
      %cst_100 = arith.constant dense<0.000000e+00> : vector<1x3xf32>
      %115 = tpu.matmul %113, %114, %cst_100 {dimension_numbers = #tpu.dot_dimension_numbers<[1], [0], [0], [1], [0, 0, 1, 1], [], []>} : vector<1x32xf32>, vector<32x3xf32>, vector<1x3xf32> -> vector<1x3xf32>
      %c0_101 = arith.constant 0 : index
      %c0_102 = arith.constant 0 : index
      %116 = vector.load %arg15[%c0_101, %c0_102] : memref<1x3xf32, #tpu.memory_space<vmem>>, vector<1x3xf32>
      %117 = arith.addf %115, %116 : vector<1x3xf32>
      %c0_103 = arith.constant 0 : index
      %118 = arith.index_cast %19 : i32 to index
      %c0_104 = arith.constant 0 : index
      %119 = vector.load %arg16[%c0_103, %118, %c0_104] : memref<1x8x3xf32, #tpu.memory_space<vmem>>, vector<1x1x3xf32>
      %120 = vector.shape_cast %119 : vector<1x1x3xf32> to vector<1x3xf32>
      %121 = vector.shape_cast %117 : vector<1x3xf32> to vector<1x1x3xf32>
      tpu.vector_store %arg16[%c0_103, %118, %c0_104], %121 {strides = array<i32>} : memref<1x8x3xf32, #tpu.memory_space<vmem>>, vector<1x1x3xf32>,
      %c0_105 = arith.constant 0 : index
      %122 = arith.index_cast %19 : i32 to index
      %c0_106 = arith.constant 0 : index
      %123 = vector.load %arg18[%c0_105, %122, %c0_106] : memref<1x8x8xf32, #tpu.memory_space<vmem>>, vector<1x1x8xf32>
      %124 = vector.shape_cast %123 : vector<1x1x8xf32> to vector<1x8xf32>
      %125 = vector.shape_cast %44 : vector<1x8xf32> to vector<1x1x8xf32>
      tpu.vector_store %arg18[%c0_105, %122, %c0_106], %125 {strides = array<i32>} : memref<1x8x8xf32, #tpu.memory_space<vmem>>, vector<1x1x8xf32>,
      %c0_107 = arith.constant 0 : index
      %c0_108 = arith.constant 0 : index
      %126 = vector.load %arg19[%c0_107, %c0_108] : memref<1x32xf32, #tpu.memory_space<vmem>>, vector<1x32xf32>
      tpu.vector_store %arg19[%c0_107, %c0_108], %113 {strides = array<i32>} : memref<1x32xf32, #tpu.memory_space<vmem>>, vector<1x32xf32>,
      %c0_109 = arith.constant 0 : index
      %c0_110 = arith.constant 0 : index
      %127 = vector.load %arg20[%c0_109, %c0_110] : memref<1x3xf32, #tpu.memory_space<vmem>>, vector<1x3xf32>
      tpu.vector_store %arg20[%c0_109, %c0_110], %117 {strides = array<i32>} : memref<1x3xf32, #tpu.memory_space<vmem>>, vector<1x3xf32>,
    }
    %c8_i32_16 = arith.constant 8 : i32
    %c0_17 = arith.constant 0 : index
    %c0_18 = arith.constant 0 : index
    %14 = vector.load %arg19[%c0_17, %c0_18] : memref<1x32xf32, #tpu.memory_space<vmem>>, vector<1x32xf32>
    %c0_19 = arith.constant 0 : index
    %c0_20 = arith.constant 0 : index
    %c0_21 = arith.constant 0 : index
    %15 = vector.load %arg17[%c0_19, %c0_20, %c0_21] : memref<1x1x32xf32, #tpu.memory_space<vmem>>, vector<1x1x32xf32>
    %16 = vector.shape_cast %15 : vector<1x1x32xf32> to vector<1x32xf32>
    %17 = vector.shape_cast %14 : vector<1x32xf32> to vector<1x1x32xf32>
    tpu.vector_store %arg17[%c0_19, %c0_20, %c0_21], %17 {strides = array<i32>} : memref<1x1x32xf32, #tpu.memory_space<vmem>>, vector<1x1x32xf32>,
    return
  }
  func.func @transform_0(%arg0: i32) -> (i32, i32, i32) {
    %c0_i32 = arith.constant 0 : i32
    %c0_i32_0 = arith.constant 0 : i32
    %c0_i32_1 = arith.constant 0 : i32
    return %arg0, %c0_i32, %c0_i32_0 : i32, i32, i32
  }
  func.func @transform_1(%arg0: i32) -> (i32, i32, i32) {
    %c0_i32 = arith.constant 0 : i32
    %c0_i32_0 = arith.constant 0 : i32
    %c0_i32_1 = arith.constant 0 : i32
    return %arg0, %c0_i32, %c0_i32_0 : i32, i32, i32
  }
  func.func @transform_2(%arg0: i32) -> (i32, i32) {
    %c0_i32 = arith.constant 0 : i32
    %c0_i32_0 = arith.constant 0 : i32
    %c0_i32_1 = arith.constant 0 : i32
    return %c0_i32, %c0_i32_0 : i32, i32
  }
  func.func @transform_3(%arg0: i32) -> (i32, i32) {
    %c0_i32 = arith.constant 0 : i32
    %c0_i32_0 = arith.constant 0 : i32
    %c0_i32_1 = arith.constant 0 : i32
    return %c0_i32, %c0_i32_0 : i32, i32
  }
  func.func @transform_4(%arg0: i32) -> (i32, i32) {
    %c0_i32 = arith.constant 0 : i32
    %c0_i32_0 = arith.constant 0 : i32
    %c0_i32_1 = arith.constant 0 : i32
    return %c0_i32, %c0_i32_0 : i32, i32
  }
  func.func @transform_5(%arg0: i32) -> (i32, i32) {
    %c0_i32 = arith.constant 0 : i32
    %c0_i32_0 = arith.constant 0 : i32
    %c0_i32_1 = arith.constant 0 : i32
    return %c0_i32, %c0_i32_0 : i32, i32
  }
  func.func @transform_6(%arg0: i32) -> (i32, i32) {
    %c0_i32 = arith.constant 0 : i32
    %c0_i32_0 = arith.constant 0 : i32
    %c0_i32_1 = arith.constant 0 : i32
    return %c0_i32, %c0_i32_0 : i32, i32
  }
  func.func @transform_7(%arg0: i32) -> (i32, i32) {
    %c0_i32 = arith.constant 0 : i32
    %c0_i32_0 = arith.constant 0 : i32
    %c0_i32_1 = arith.constant 0 : i32
    return %c0_i32, %c0_i32_0 : i32, i32
  }
  func.func @transform_8(%arg0: i32) -> (i32, i32, i32) {
    %c0_i32 = arith.constant 0 : i32
    %c0_i32_0 = arith.constant 0 : i32
    %c0_i32_1 = arith.constant 0 : i32
    %c0_i32_2 = arith.constant 0 : i32
    return %c0_i32, %c0_i32_0, %c0_i32_1 : i32, i32, i32
  }
  func.func @transform_9(%arg0: i32) -> (i32, i32, i32) {
    %c0_i32 = arith.constant 0 : i32
    %c0_i32_0 = arith.constant 0 : i32
    %c0_i32_1 = arith.constant 0 : i32
    %c0_i32_2 = arith.constant 0 : i32
    return %c0_i32, %c0_i32_0, %c0_i32_1 : i32, i32, i32
  }
  func.func @transform_10(%arg0: i32) -> (i32, i32, i32) {
    %c0_i32 = arith.constant 0 : i32
    %c0_i32_0 = arith.constant 0 : i32
    %c0_i32_1 = arith.constant 0 : i32
    %c0_i32_2 = arith.constant 0 : i32
    return %c0_i32, %c0_i32_0, %c0_i32_1 : i32, i32, i32
  }
  func.func @transform_11(%arg0: i32) -> (i32, i32, i32) {
    %c0_i32 = arith.constant 0 : i32
    %c0_i32_0 = arith.constant 0 : i32
    %c0_i32_1 = arith.constant 0 : i32
    %c0_i32_2 = arith.constant 0 : i32
    return %c0_i32, %c0_i32_0, %c0_i32_1 : i32, i32, i32
  }
  func.func @transform_12(%arg0: i32) -> (i32, i32, i32) {
    %c0_i32 = arith.constant 0 : i32
    %c0_i32_0 = arith.constant 0 : i32
    %c0_i32_1 = arith.constant 0 : i32
    %c0_i32_2 = arith.constant 0 : i32
    return %c0_i32, %c0_i32_0, %c0_i32_1 : i32, i32, i32
  }
  func.func @transform_13(%arg0: i32) -> (i32, i32) {
    %c0_i32 = arith.constant 0 : i32
    %c0_i32_0 = arith.constant 0 : i32
    %c0_i32_1 = arith.constant 0 : i32
    return %c0_i32, %c0_i32_0 : i32, i32
  }
  func.func @transform_14(%arg0: i32) -> (i32, i32) {
    %c0_i32 = arith.constant 0 : i32
    %c0_i32_0 = arith.constant 0 : i32
    %c0_i32_1 = arith.constant 0 : i32
    return %c0_i32, %c0_i32_0 : i32, i32
  }
  func.func @transform_15(%arg0: i32) -> (i32, i32, i32) {
    %c0_i32 = arith.constant 0 : i32
    %c0_i32_0 = arith.constant 0 : i32
    %c0_i32_1 = arith.constant 0 : i32
    return %arg0, %c0_i32, %c0_i32_0 : i32, i32, i32
  }
  func.func @transform_16(%arg0: i32) -> (i32, i32, i32) {
    %c0_i32 = arith.constant 0 : i32
    %c0_i32_0 = arith.constant 0 : i32
    %c0_i32_1 = arith.constant 0 : i32
    return %arg0, %c0_i32, %c0_i32_0 : i32, i32, i32
  }
  func.func @transform_17(%arg0: i32) -> (i32, i32, i32) {
    %c0_i32 = arith.constant 0 : i32
    %c0_i32_0 = arith.constant 0 : i32
    %c0_i32_1 = arith.constant 0 : i32
    return %arg0, %c0_i32, %c0_i32_0 : i32, i32, i32
  }
}

</mosaic_0001>

<bundles_post_ra>
// kernel: tpu_custom_call.1
= control target key start
LH: loop header
LB: loop body
LE: loop exit
PB: predicated region body
PF: predicated region fallthrough
CT: control target
= control target key end

     0   :  { %s3426_s0 = inlined_call_operand.hbm [shape: f32[2,8,32], index: 0, kind: input, shape index: {}]   ;;  %s3427_s1 = inlined_call_operand.hbm [shape: f32[2,1,32], index: 1, kind: input, shape index: {}]   ;;  %s3428_s2 = inlined_call_operand.vmem [shape: f32[32,32], index: 2, kind: input, shape index: {}]   ;;  %s3429_s3 = inlined_call_operand.hbm [shape: f32[1,32], index: 3, kind: input, shape index: {}]   ;;  %s3430_s4 = inlined_call_operand.hbm [shape: f32[32,32], index: 4, kind: input, shape index: {}]   ;;  %s3431_s5 = inlined_call_operand.vmem [shape: f32[1,32], index: 5, kind: input, shape index: {}]   ;;  %s3432_s6 = inlined_call_operand.vmem [shape: f32[1,32], index: 6, kind: input, shape index: {}]   ;;  %s3433_s7 = inlined_call_operand.<no memory space> [shape: f32[1,1], index: 7, kind: input, shape index: {}]   ;;  %s3434_s8 = inlined_call_operand.hbm [shape: f32[3,32,32], index: 8, kind: input, shape index: {}]   ;;  %s3435_s9 = inlined_call_operand.vmem [shape: f32[3,3,32], index: 9, kind: input, shape index: {}]   ;;  %s3436_s10 = inlined_call_operand.vmem [shape: f32[3,1,32], index: 10, kind: input, shape index: {}]   ;;  %s3437_s11 = inlined_call_operand.hbm [shape: f32[3,32,32], index: 11, kind: input, shape index: {}]   ;;  %s3438_s12 = inlined_call_operand.vmem [shape: f32[3,1,32], index: 12, kind: input, shape index: {}]   ;;  %s3439_s13 = inlined_call_operand.vmem [shape: f32[32,3], index: 13, kind: input, shape index: {}]   ;;  %s3440_s14 = inlined_call_operand.vmem [shape: f32[1,3], index: 14, kind: input, shape index: {}]   ;;  %s3441_s15 = inlined_call_operand.vmem [shape: f32[2,8,3], index: 15, kind: output, shape index: {0}]   ;;  %s3442_s16 = inlined_call_operand.hbm [shape: f32[2,1,32], index: 16, kind: output, shape index: {1}]   ;;  %s3443_s17 = inlined_call_operand.hbm [shape: f32[2,8,8], index: 17, kind: output, shape index: {2}]  }
   0x1   :  { %3455 = sst [smem:[#allocation29_spill]] %s3426_s0  ;;  %v23_v0 = vstv %s3433_s7 }
   0x2   :  { %3456 = sst [smem:[#allocation30_spill]] %s3427_s1  ;;  %24 = vst [vmem:[#allocation5] sm:$0x1] %v23_v0 }
   0x3   :  { %3457 = sst [smem:[#allocation31_spill]] %s3428_s2 }
   0x4   :  { %3458 = sst [smem:[#allocation32_spill]] %s3429_s3 }
   0x5   :  { %3459 = sst [smem:[#allocation33_spill]] %s3430_s4 }
   0x6   :  { %3460 = sst [smem:[#allocation34_spill]] %s3431_s5 }
   0x7   :  { %3461 = sst [smem:[#allocation35_spill]] %s3434_s8 }
   0x8   :  { %3462 = sst [smem:[#allocation36_spill]] %s3437_s11 }
   0x9   :  { %3463 = sst [smem:[#allocation37_spill]] %s3438_s12 }
   0xa   :  { %3464 = sst [smem:[#allocation38_spill]] %s3440_s14 }
   0xb   :  { %3465 = sst [smem:[#allocation39_spill]] %s3442_s16 }
   0xc   :  { %3466 = sst [smem:[#allocation40_spill]] %s3443_s17 }
   0xd   :  { %25 = vsyncpa [#allocation7], 0 }
   0xe   :  { %27 = vsyncpa [#allocation7 + $0x1], 0 }
   0xf   :  { %28 = vsyncpa [#allocation10], 0 }
  0x10   :  { %30 = vsyncpa [#allocation10 + $0x1], 0 }
  0x11   :  { %31 = vsyncpa [#allocation13], 0 }
  0x12   :  { %32 = vsyncpa [#allocation16], 0 }
  0x13   :  { %33 = vsyncpa [#allocation8], 0 }
  0x14   :  { %35 = vsyncpa [#allocation8 + $0x1], 0 }
  0x15   :  { %36 = vsyncpa [#allocation19], 0 }
  0x16   :  { %38 = vsyncpa [#allocation19 + $0x1], 0  ;;  %s2891_s26 = smov 0   ;;  %s2893_s27 = smov 0  }
  0x17   :  { %s2895_s28 = smov 0   ;;  %s2897_s29 = smov 0  }
  0x18 LB: > { %3467 = sst [smem:[#allocation27_spill]] %s2771_s28  ;;  %s2781_s7 = smov [#allocation11]   ;;  %s2775_s29 = sphi %s2897_s29, %s3506_s29   ;;  %s2771_s28 = sphi %s2895_s28, %s3503_s28   ;;  %s2767_s27 = sphi %s2893_s27, %s3505_s27   ;;  %s2763_s26 = sphi %s2891_s26, %s3504_s26  }
  0x19   : > { %s468_s0 = sshll.u32 %s2781_s7, 4  ;;  %s2912_s30 = sadd.s32 4294967295, %s2775_s29   ;;  %s2917_s0 = int_to_ptr.vmem [resolvable:$true] %s468_s0 }
  0x1a   : > { %p2060_p0 = scmp.ge.s32.totalorder %s2775_s29, 1  ;;  %p3449_p1 = scmp.eq.s32.totalorder %s2912_s30, 0 }
  0x1b   : > { %p452_p2 = scmp.lt.s32.totalorder %s2775_s29, 3  ;;  %s2782_s19 = smov [#allocation12]  }
  0x1c   : > { %s478_s1 = sshll.u32 %s2782_s19, 4  ;;  %s2783_s21 = smov [#allocation14]   ;;  %s2926_s1 = int_to_ptr.vmem [resolvable:$true] %s478_s1 }
  0x1d   : > { %p2919_p3 = pnand %p2060_p0, %p452_p2  ;;  %s500_s22 = sshll.u32 %s2783_s21, 4  ;;  %s2934_s22 = int_to_ptr.vmem [resolvable:$true] %s500_s22 }
  0x1e   : > { %s3470_s3 = sld [smem:[#allocation32_spill]] }
  0x1f   : > { %s3468_s18 = scalar_select %p2919_p3, 1, 0 }
  0x20   : > { %p2378_p5 = pneg %p2919_p3 }
  0x22   : > { %p2930_p6 = pnand %p2378_p5, %p3449_p1 }
  0x24   : > { %s2485_s25 = scalar_lea.hbm %s3470_s3, 16  ;;  %p2944_p8 = pneg %p2930_p6 }
  0x25   : > { %p2486_p7 = scmp.ne.s32.totalorder %s3470_s3, %s2485_s25  ;;  %p2492_p11 = scmp.lt.u32.totalorder %s2485_s25, %s3470_s3 }
  0x27   : > { %p2488_p9 = pnand %p2944_p8, %p2486_p7 }
  0x29   : > { %p2489_p10 = pneg %p2488_p9 }
  0x2b   : > { %p2494_p12 = pnand %p2492_p11, %p2489_p10 }
  0x2d   : > { %2497 = shalt.err (!%p2494_p12)
}
  0x2e   : > { %s2498_s17 = scalar_lea.vmem %s2917_s0, 16  ;;  %s2505_s23 = scalar_lea.vmem %s2917_s0, 32 }
  0x2f   : > { %p2499_p13 = scmp.ne.s32.totalorder %s2917_s0, %s2498_s17  ;;  %p2506_p5 = scmp.lt.s32.totalorder %s2917_s0, %s2917_s0 }
  0x30   : > { %p2507_p7 = scmp.lt.s32.totalorder %s2505_s23, %s2498_s17 }
  0x31   : > { %p2501_p0 = pnand %p2499_p13, %p2944_p8 }
  0x32   : > { %p2508_p9 = por %p2507_p7, %p2506_p5 }
  0x33   : > { %p2502_p2 = pneg %p2501_p0 }
  0x35   : > { %p2509_p4 = pnand %p2508_p9, %p2502_p2 }
  0x37   : > { %2512 = shalt.err (!%p2509_p4)
}
  0x38   : > { %2381 = dma.hbm_to_vmem [thread:$0]  (!%p2930_p6), %s3470_s3, 16, %s2917_s0, [#allocation10]  }
  0x39   : > { %s3472_s4 = sld [smem:[#allocation33_spill]] }
  0x3f   : > { %s2513_s21 = scalar_lea.hbm %s3472_s4, 512 }
  0x40   : > { %p2514_p10 = scmp.ne.s32.totalorder %s3472_s4, %s2513_s21  ;;  %p2520_p4 = scmp.lt.u32.totalorder %s2513_s21, %s3472_s4 }
  0x42   : > { %p2516_p11 = pnand %p2514_p10, %p2944_p8 }
  0x44   : > { %p2517_p12 = pneg %p2516_p11 }
  0x46   : > { %p2522_p13 = pnand %p2520_p4, %p2517_p12 }
  0x48   : > { %2525 = shalt.err (!%p2522_p13)
}
  0x49   : > { %s2526_s0 = scalar_lea.vmem %s2926_s1, 512  ;;  %p2534_p7 = scmp.lt.s32.totalorder %s2926_s1, %s2926_s1 }
  0x4a   : > { %p2527_p0 = scmp.ne.s32.totalorder %s2926_s1, %s2526_s0  ;;  %p2535_p9 = scmp.lt.s32.totalorder %s2526_s0, %s2526_s0 }
  0x4c   : > { %p2529_p2 = pnand %p2527_p0, %p2944_p8  ;;  %p2536_p10 = por %p2535_p9, %p2534_p7 }
  0x4e   : > { %p2530_p5 = pneg %p2529_p2 }
  0x50   : > { %p2537_p11 = pnand %p2536_p10, %p2530_p5 }
  0x52   : > { %2540 = shalt.err (!%p2537_p11)
}
  0x53   : > { %s2784_s12 = smov 128   ;;  %s2785_s14 = smov 8  }
  0x54   : > { %2384 = dma.hbm_to_vmem [thread:$0]  (!%p2930_p6), %s3472_s4, 512, %s2926_s1, [#allocation13], %s2784_s12, %s2784_s12, %s2785_s14  }
  0x55   : > { %s3473_s8 = sld [smem:[#allocation35_spill]] }
  0x5b   : > { %s2541_s21 = scalar_lea.hbm %s3473_s8, 1536 }
  0x5c   : > { %p2542_p12 = scmp.ne.s32.totalorder %s3473_s8, %s2541_s21  ;;  %p2548_p0 = scmp.lt.u32.totalorder %s2541_s21, %s3473_s8 }
  0x5e   : > { %p2544_p4 = pnand %p2542_p12, %p2944_p8 }
  0x60   : > { %p2545_p13 = pneg %p2544_p4 }
  0x62   : > { %p2550_p2 = pnand %p2548_p0, %p2545_p13 }
  0x64   : > { %2553 = shalt.err (!%p2550_p2)
}
  0x65   : > { %s2554_s1 = scalar_lea.vmem %s2934_s22, 1536  ;;  %p2562_p10 = scmp.lt.s32.totalorder %s2934_s22, %s2934_s22 }
  0x66   : > { %p2555_p5 = scmp.ne.s32.totalorder %s2934_s22, %s2554_s1  ;;  %p2563_p11 = scmp.lt.s32.totalorder %s2554_s1, %s2554_s1 }
  0x68   : > { %p2557_p7 = pnand %p2555_p5, %p2944_p8  ;;  %p2564_p12 = por %p2563_p11, %p2562_p10 }
  0x6a   : > { %p2558_p9 = pneg %p2557_p7 }
  0x6c   : > { %p2565_p4 = pnand %p2564_p12, %p2558_p9 }
  0x6e   : > { %2568 = shalt.err (!%p2565_p4)
}
  0x6f   : > { %2387 = dma.hbm_to_vmem [thread:$0]  (!%p2930_p6), %s3473_s8, 1536, %s2934_s22, [#allocation13], %s2784_s12, %s2784_s12, %s2785_s14  }
  0x70   : > { %s2786_s24 = smov [#allocation15]   ;;  %s3474_s11 = sld [smem:[#allocation36_spill]] }
  0x71   : > { %s519_s25 = sshll.u32 %s2786_s24, 4  ;;  %s520_s25 = int_to_ptr.vmem [resolvable:$true] %s519_s25 }
  0x76   : > { %s2569_s17 = scalar_lea.hbm %s3474_s11, 1536 }
  0x77   : > { %p2570_p13 = scmp.ne.s32.totalorder %s3474_s11, %s2569_s17  ;;  %p2576_p5 = scmp.lt.u32.totalorder %s2569_s17, %s3474_s11 }
  0x79   : > { %p2572_p0 = pnand %p2570_p13, %p2944_p8 }
  0x7b   : > { %p2573_p2 = pneg %p2572_p0 }
  0x7d   : > { %p2578_p7 = pnand %p2576_p5, %p2573_p2 }
  0x7f   : > { %2581 = shalt.err (!%p2578_p7)
}
  0x80   : > { %s2582_s22 = scalar_lea.vmem %s520_s25, 1536  ;;  %p2590_p12 = scmp.lt.s32.totalorder %s520_s25, %s520_s25 }
  0x81   : > { %p2583_p9 = scmp.ne.s32.totalorder %s520_s25, %s2582_s22  ;;  %p2591_p4 = scmp.lt.s32.totalorder %s2582_s22, %s2582_s22 }
  0x83   : > { %p2585_p10 = pnand %p2583_p9, %p2944_p8  ;;  %p2592_p1 = por %p2591_p4, %p2590_p12 }
  0x85   : > { %p2586_p11 = pneg %p2585_p10 }
  0x87   : > { %p2593_p3 = pnand %p2592_p1, %p2586_p11 }
  0x89   : > { %2596 = shalt.err (!%p2593_p3)
}
  0x8a   : > { %2390 = dma.hbm_to_vmem [thread:$0]  (!%p2930_p6), %s3474_s11, 1536, %s520_s25, [#allocation16], %s2784_s12, %s2784_s12, %s2785_s14  }
  0x8b   : > { %s2059_s20 = sadd.s32 4294967294, %s2775_s29   ;;  %s3041_s19 = sadd.s32 1, %s2775_s29  }
  0x8c   : > { %s48_s16 = ssub.s32 %s2775_s29, %s3041_s19  ;;  %s51_s24 = sadd.s32 1, %s2771_s28 }
  0x8d   : > { %p49_p1 = scmp.eq.s32.totalorder %s48_s16, 0  ;;  %p58_p3 = scmp.ne.s32.totalorder %s2771_s28, %s2767_s27 }
  0x8e   : > { %p59_p8 = scmp.eq.s32.totalorder %s2775_s29, 0  ;;  %p64_p13 = scmp.ne.s32.totalorder %s2767_s27, %s2763_s26 }
  0x8f   : > { %s3052_s7 = scalar_select %p49_p1, %s2771_s28, %s51_s24  }
  0x90   : > { %p3054_p0 = por %p59_p8, %p58_p3  ;;  %p3477_p2 = scmp.eq.s32.totalorder %s2912_s30, 0 }
  0x91   : > { %3475 = sst [smem:[#allocation28_spill]] %s3052_s7  ;;  %p413_p5 = scmp.eq.s32.totalorder %s2912_s30, 1 }
  0x92   : > { %p3060_p6 = por %p3477_p2, %p64_p13  ;;  %p419_p7 = scmp.eq.s32.totalorder %s2059_s20, 1 }
  0x93   : > { %p2409_p9 = scmp.lt.s32.totalorder %s2775_s29, 2  ;;  %s3067_s14 = sand.u32 1, %s2771_s28  }
  0x94   : > { %s3478_s12 = scalar_select %p3060_p6, 1, 0 }
  0x95   : > { %p3069_p10 = por %p413_p5, %p58_p3  ;;  %p3073_p11 = por %p419_p7, %p64_p13 }
  0x96   : > { %s2066_s23 = sshll.u32 %s3067_s14, 3  ;;  %s2067_s0 = sshll.u32 %s2775_s29, 7 }
  0x97   : > { %s3479_s25 = scalar_select %p3069_p10, 1, 0 }
  0x98   : > { %s3480_s17 = scalar_select %p3073_p11, 1, 0 }
  0x99   : > { %s3481_s4 = sld [smem:[#allocation29_spill]]  ;;  %s546_s20 = scalar_lea.vmem [#allocation6], %s2066_s23 }
  0x9a   : > { %s553_s16 = sshll.u32 %s546_s20, 4  ;;  %p3088_p12 = pnand %p2409_p9, %p3054_p0  ;;  %s3084_s16 = int_to_ptr.vmem [resolvable:$true] %s553_s16 }
  0x9b   : > { %s543_s11 = scalar_lea.sflag [#allocation7], %s3067_s14 }
  0x9c   : > { %p2599_p1 = pneg %p3088_p12 }
  0x9f   : > { %s3082_s3 = scalar_lea.hbm %s3481_s4, %s2067_s0  ;;  %s2602_s21 = scalar_lea.hbm %s3481_s4, 256 }
  0xa0   : > { %s2597_s1 = scalar_lea.hbm %s3082_s3, 128  ;;  %p2603_p13 = scmp.lt.u32.totalorder %s3082_s3, %s3481_s4 }
  0xa1   : > { %p2598_p4 = scmp.ne.s32.totalorder %s3082_s3, %s2597_s1  ;;  %p2604_p0 = scmp.lt.u32.totalorder %s2602_s21, %s2597_s1 }
  0xa2   : > { %p2606_p5 = scmp.lt.u32.totalorder %s2597_s1, %s3082_s3 }
  0xa3   : > { %p2600_p3 = pnand %p2599_p1, %p2598_p4  ;;  %p2605_p2 = por %p2604_p0, %p2603_p13 }
  0xa5   : > { %p2601_p8 = pneg %p2600_p3  ;;  %p2607_p7 = por %p2606_p5, %p2605_p2 }
  0xa7   : > { %p2608_p9 = pnand %p2607_p7, %p2601_p8 }
  0xa9   : > { %2611 = shalt.err (!%p2608_p9)
}
  0xaa   : > { %s2612_s8 = scalar_lea.vmem %s3084_s16, 128  ;;  %s2787_s23 = smov [#allocation6]  }
  0xab   : > { %p2613_p4 = scmp.ne.s32.totalorder %s3084_s16, %s2612_s8  ;;  %s2617_s0 = sshll.u32 %s2787_s23, 4  ;;  %s2618_s0 = int_to_ptr.vmem [resolvable:$false] %s2617_s0 }
  0xac   : > { %s2619_s22 = scalar_lea.vmem %s2618_s0, 256  ;;  %p2620_p10 = scmp.lt.s32.totalorder %s3084_s16, %s2618_s0 }
  0xad   : > { %p2615_p3 = pnand %p2613_p4, %p2599_p1  ;;  %p2621_p13 = scmp.lt.s32.totalorder %s2619_s22, %s2612_s8 }
  0xaf   : > { %p2616_p11 = pneg %p2615_p3  ;;  %p2622_p0 = por %p2621_p13, %p2620_p10 }
  0xb1   : > { %p2623_p2 = pnand %p2622_p0, %p2616_p11 }
  0xb3   : > { %2626 = shalt.err (!%p2623_p2)
}
  0xb4   : > { %2394 = dma.hbm_to_vmem [thread:$0]  (!%p3088_p12), %s3082_s3, 128, %s3084_s16, %s543_s11  }
  0xb5   : > { %s2068_s1 = sshll.u32 %s2775_s29, 4  ;;  %s563_s21 = scalar_lea.vmem [#allocation9], %s3067_s14 }
  0xb6   : > { %s570_s20 = sshll.u32 %s563_s21, 4  ;;  %s3483_s7 = sld [smem:[#allocation30_spill]]  ;;  %s571_s20 = int_to_ptr.vmem [resolvable:$true] %s570_s20 }
  0xb7   : > { %s3484_s8 = sand.u32 1, %s2775_s29  }
  0xb8   : > { %s561_s22 = scalar_lea.sflag [#allocation10], %s3484_s8 }
  0xbc   : > { %s3124_s0 = scalar_lea.hbm %s3483_s7, %s2068_s1  ;;  %s2632_s3 = scalar_lea.hbm %s3483_s7, 32 }
  0xbd   : > { %s2627_s28 = scalar_lea.hbm %s3124_s0, 16  ;;  %p2633_p5 = scmp.lt.u32.totalorder %s3124_s0, %s3483_s7 }
  0xbe   : > { %p2628_p10 = scmp.ne.s32.totalorder %s3124_s0, %s2627_s28  ;;  %p2634_p7 = scmp.lt.u32.totalorder %s2632_s3, %s2627_s28 }
  0xbf   : > { %p2636_p4 = scmp.lt.u32.totalorder %s2627_s28, %s3124_s0 }
  0xc0   : > { %p2630_p11 = pnand %p2628_p10, %p2599_p1  ;;  %p2635_p9 = por %p2634_p7, %p2633_p5 }
  0xc2   : > { %p2631_p8 = pneg %p2630_p11  ;;  %p2637_p3 = por %p2636_p4, %p2635_p9 }
  0xc4   : > { %p2638_p13 = pnand %p2637_p3, %p2631_p8 }
  0xc6   : > { %2641 = shalt.err (!%p2638_p13)
}
  0xc7   : > { %s2642_s1 = scalar_lea.vmem %s571_s20, 16  ;;  %s2788_s21 = smov [#allocation9]  }
  0xc8   : > { %p2643_p0 = scmp.ne.s32.totalorder %s571_s20, %s2642_s1  ;;  %s2647_s23 = sshll.u32 %s2788_s21, 4  ;;  %s2648_s23 = int_to_ptr.vmem [resolvable:$false] %s2647_s23 }
  0xc9   : > { %s2649_s8 = scalar_lea.vmem %s2648_s23, 32  ;;  %p2650_p11 = scmp.lt.s32.totalorder %s571_s20, %s2648_s23 }
  0xca   : > { %p2645_p2 = pnand %p2643_p0, %p2599_p1  ;;  %p2651_p6 = scmp.lt.s32.totalorder %s2649_s8, %s2642_s1 }
  0xcc   : > { %p2646_p10 = pneg %p2645_p2  ;;  %p2652_p5 = por %p2651_p6, %p2650_p11 }
  0xce   : > { %p2653_p7 = pnand %p2652_p5, %p2646_p10 }
  0xd0   : > { %2656 = shalt.err (!%p2653_p7)
}
  0xd1   : > { %2397 = dma.hbm_to_vmem [thread:$0]  (!%p3088_p12), %s3124_s0, 16, %s571_s20, %s561_s22  }
  0xd2   : > { %p3485_p8 = scmp.ne.s32.totalorder %s3468_s18, 0 }
  0xd3   : > { %s3150_s28 = sand.u32 (!%p3485_p8), 1, %s2767_s27   ;;  %p3486_p6 = scmp.ne.s32.totalorder (!%p3485_p8), %s3478_s12, 0 }
  0xd4   : > { %579 = sbr.rel (%p3485_p8) target bundleno = 1968 (0x7b0), region = 80  ;;  %s2070_s11 = sshll.u32 (!%p3485_p8), %s3150_s28, 3 }
  0xd5   : > { %s582_s14 = scalar_lea.sflag (!%p3485_p8), [#allocation7], %s3150_s28  ;;  %s3156_s3 = scalar_lea.vmem (!%p3485_p8), [#allocation6], %s2070_s11 }
  0xdb   : > { %2734 = dma.done.wait (%p3486_p6), %s582_s14, 128  }
  0xdc   : > { %2736 = vsyncadd (%p3486_p6), %s582_s14, 4294967168  ;;  %s590_s18 = sand.u32 1, %s2912_s30   ;;  %s593_s20 = scalar_lea.vmem [#allocation9], %s3150_s28 }
  0xdd   : > { %s591_s24 = scalar_lea.sflag [#allocation10], %s590_s18 }
  0xde   : > { %2738 = dma.done.wait (%p3486_p6), %s591_s24, 16  }
  0xdf   : > { %2740 = vsyncadd (%p3486_p6), %s591_s24, 4294967280  ;;  %p3487_p12 = scmp.eq.s32.totalorder %s2912_s30, 0 }
  0xe1   : > { %2742 = dma.done.wait (%p3487_p12), [#allocation10], 16   ;;  %p3488_p1 = pmov %p3487_p12 }
  0xe3   : > { %2744 = vsyncadd (%p3488_p1), [#allocation10], 4294967280  ;;  %p3489_p9 = pmov %p3488_p1 }
  0xe4   : > { %p3490_p4 = pmov %p3488_p1 }
  0xe5   : > { %2746 = dma.done.wait (%p3489_p9), [#allocation13], 2048  }
  0xe6   : > { %2748 = vsyncadd (%p3490_p4), [#allocation13], 4294965248  ;;  %p3491_p3 = pmov %p3488_p1 }
  0xe7   : > { %p3492_p13 = pmov %p3488_p1 }
  0xe8   : > { %2750 = dma.done.wait (%p3491_p3), [#allocation16], 1536  }
  0xe9   : > { %2752 = vsyncadd (%p3492_p13), [#allocation16], 4294965760  ;;  %p672_p0 = scmp.lt.s32.totalorder %s2912_s30, 1  ;;  %v2789_v1 = vmov 0.0|0.0   ;;  %vm766_vm0 = vcmask 16384   ;;  %vm2790_vm1 = vmmov 0  }
  0xea   : > { %2288 = vmatprep.subr.bf16.mxu0 %v2789_v1  ;;  %v2791_v2 = vmov 0.0   ;;  %vm764_vm2 = vcmask 253952   ;;  %v763_v3 = vld [vmem:[%s593_s20] sm:$0x1]  ;;  %v678_v5 = vld [vmem:[#allocation12 + $0x8] sm:$0xff]  ;;  %v679_v7 = vld [vmem:[#allocation12 + $0x10] sm:$0xff] }
  0xeb   : > { %2172 = vmatprep.mubr.msk.f32.mxu0 %vm2790_vm1, %v2791_v2  ;;  %767 = vst.msk [vmem:[#allocation3] sm:$0x1] %vm766_vm0, %v2791_v2  ;;  %s673_s12 = scalar_select %p672_p0, %s2912_s30, 1  ;;  %v677_v4 = vld [vmem:[#allocation12] sm:$0xff]  ;;  %v680_v8 = vld [vmem:[#allocation12 + $0x18] sm:$0xff]  ;;  %vm688_vm3 = vcmask 261120  }
  0xec   : > { %765 = vst.msk [vmem:[#allocation2] sm:$0x1] %vm764_vm2, %v763_v3  ;;  %v2289_v6 = vpack.c.bf16 %v678_v5, %v677_v4  ;;  %v2292_v9 = vpack.c.bf16 %v680_v8, %v679_v7  ;;  %v3190_v10 = vld [vmem:[%s3156_s3] sm:$0xff]  ;;  %s3493_s5 = sld [smem:[#allocation34_spill]]  ;;  %s664_s23 = scalar_lea.vmem [#allocation17], %s3150_s28 }
  0xed   : > { %s2076_s0 = sshll.u32 %s673_s12, 3  ;;  %s3201_s8 = scalar_lea.vmem [#allocation18], %s2070_s11 }
  0xee   : > { %s3186_s16 = scalar_lea.vmem %s3441_s15, %s2076_s0  ;;  %2290 = vmatpush3.bf16.msra.mxu0 %v2289_v6  ;;  %s3203_s14 = smov 0  }
  0xef   : > { %2291 = vmatprep.subr.bf16.mxu0 %v2789_v1 }
  0xf2   : > { %2293 = vmatpush3.bf16.msra.mxu0 %v2292_v9  ;;  %v2077_v11 = vld [vmem:[%s3493_s5] ss:$0 sm:$0xff] }
  0xf5   : > { %2173 = vmatmul.mubr.msk.f32.vlgmr.msra.gmra.mrb[0].mxu0 %vm688_vm3, %v3190_v10 }
 0x1c8   : > { %v758_v12 = vpop.f32.mrb[0].mxu0 }
 0x1c9   : > { %v759_v13 = vadd.f32 %v2077_v11, %v758_v12  ;;  %v2174_v14 = vpop.f32.mrb[1].mxu0 }
 0x1cb   : > { %762 = vst.msk [vmem:[#allocation4] sm:$0xff] %vm688_vm3, %v759_v13 }
 0x1cc LB: >> { %s3494_s2 = sld [smem:[#allocation31_spill]]  ;;  %v2792_v18 = vmov 0.0|0.0   ;;  %vm2793_vm4 = vmmov 0   ;;  %v2794_v21 = vmov 0.0   ;;  %v3227_v23 = vld [vmem:[#allocation2] sm:$0x1]  ;;  %v855_v26 = vlaneseq  ;;  %s1828_s18 = scalar_lea.vmem %s3201_s8, %s2779_s14 [#allocation18]  ;;  %s2779_s14 = sphi %s3203_s14, %s773_s14  }
 0x1cd   : >> { %2294 = vmatprep.subr.bf16.mxu0 %v2792_v18  ;;  %2183 = vmatprep.mubr.msk.f32.mxu0 %vm2793_vm4, %v2794_v21  ;;  %v862_v24 = vld [vmem:[#allocation5] sm:$0x1]  ;;  %v2795_v25 = vmov 0   ;;  %v780_v28 = vld [vmem:[#allocation11] sm:$0x1]  ;;  %vm948_vm5 = vcmask 57344   ;;  %s1826_s1 = scalar_lea.vmem %s3186_s16, %s2779_s14 }
 0x1ce   : >> { %2186 = vmatprep.subr.mxu1 %v2794_v21  ;;  %2188 = vmatprep.mubr.msk.f32.mxu1 %vm2793_vm4, %v2794_v21  ;;  %v856_v27 = vshrl.u32 %v855_v26, 7  ;;  %v861_v37 = vld [vmem:[%s3432_s6] sm:$0x1]  ;;  %vm1043_vm6 = vcmask 1042432   ;;  %v3251_v50 = vld [vmem:[#allocation3] sm:$0x1] }
 0x1cf   : >> { %2468 = vset.pattern.permute.xlu0 %v2795_v25  ;;  %v1038_v49 = vld [vmem:[%s3435_s9] sm:$0x7]  ;;  %vm1039_vm7 = vcmask 23552   ;;  %v1035_v52 = vld [vmem:[#allocation14 + $0x8] sm:$0xff]  ;;  %v1036_v54 = vld [vmem:[#allocation14 + $0x10] sm:$0xff]  ;;  %vm960_vm8 = vcmask 64512  }
 0x1d0   : >> { %865 = vperm.xlu0 %2468, %v862_v24   ;;  %v857_v29 = vsub.s32 0, %v856_v27  ;;  %v1034_v51 = vld [vmem:[#allocation14] sm:$0xff]  ;;  %v1037_v55 = vld [vmem:[#allocation14 + $0x18] sm:$0xff]  ;;  %v1269_v62 = vld [vmem:[#allocation14 + $0x28] sm:$0xff]  ;;  %s3495_s22 = sld [smem:[#allocation37_spill]]  ;;  %s3496_s4 = sld [smem:[#allocation38_spill]] }
 0x1d1   : >> { %v2301_v53 = vpack.c.bf16 %v1035_v52, %v1034_v51  ;;  %v2304_v56 = vpack.c.bf16 %v1037_v55, %v1036_v54  ;;  %v2087_v60 = vld [vmem:[%s3435_s9 + $0x4] sm:$0x7]  ;;  %v1270_v0 = vld [vmem:[#allocation14 + $0x30] sm:$0xff]  ;;  %v1271_v1 = vld [vmem:[#allocation14 + $0x38] sm:$0xff]  ;;  %s773_s14 = sadd.s32 1, %s2779_s14  }
 0x1d2   : >> { %v776_v15 = vld [vmem:[%s3494_s2] sm:$0xff]  ;;  %v777_v16 = vld [vmem:[%s3494_s2 + $0x8] sm:$0xff]  ;;  %v778_v17 = vld [vmem:[%s3494_s2 + $0x10] sm:$0xff]  ;;  %v2316_v2 = vpack.c.bf16 %v1271_v1, %v1270_v0  ;;  %p770_p2 = scmp.ge.s32.totalorder %s773_s14, 8  }
 0x1d3   : >> { %v2295_v19 = vpack.c.bf16 %v777_v16, %v776_v15  ;;  %v779_v20 = vld [vmem:[%s3494_s2 + $0x18] sm:$0xff]  ;;  %v854_v33 = vld [vmem:[#allocation4] sm:$0xff]  ;;  %v1194_v9 = vld [vmem:[#allocation15 + $0x10] sm:$0xff]  ;;  %s2105_s21 = sshll.u32 (%p770_p2), %s2912_s30, 4  ;;  %s3497_s24 = sld [smem:[#allocation39_spill]] (%p770_p2) }
 0x1d4   : >> { %v2298_v22 = vpack.c.bf16 %v779_v20, %v778_v17  ;;  %v1268_v61 = vld [vmem:[#allocation14 + $0x20] sm:$0xff]  ;;  %v1193_v5 = vld [vmem:[#allocation15 + $0x8] sm:$0xff]  ;;  %v1195_v11 = vld [vmem:[#allocation15 + $0x18] sm:$0xff]  ;;  %s1859_s12 = sshll.u32 (%p770_p2), %s664_s23, 4  ;;  %s1839_s14 = scalar_lea.sflag (%p770_p2), [#allocation8], %s3150_s28  ;;  %s1860_s12 = int_to_ptr.vmem [resolvable:$true] %s1859_s12 }
 0x1d5   : >> { %2296 = vmatpush3.bf16.msra.mxu0 %v2295_v19  ;;  %v2313_v63 = vpack.c.bf16 %v1269_v62, %v1268_v61  ;;  %v1421_v3 = vld [vmem:[#allocation15 + $0x20] sm:$0xff]  ;;  %v1422_v6 = vld [vmem:[#allocation15 + $0x28] sm:$0xff]  ;;  %v1423_v12 = vld [vmem:[#allocation15 + $0x30] sm:$0xff]  ;;  %v2310_v16 = vpack.c.bf16 %v1195_v11, %v1194_v9  ;;  %s2657_s0 = scalar_lea.vmem (%p770_p2), %s1860_s12, 16  ;;  %p3498_p11 = scmp.ne.s32.totalorder (%p770_p2), %s3479_s25, 0 }
 0x1d6   : >> { %2297 = vmatprep.subr.bf16.mxu0 %v2792_v18  ;;  %v1192_v4 = vld [vmem:[#allocation15] sm:$0xff]  ;;  %v2319_v8 = vpack.c.bf16 %v1422_v6, %v1421_v3  ;;  %v1424_v13 = vld [vmem:[#allocation15 + $0x38] sm:$0xff]  ;;  %v1499_v20 = vld [vmem:[#allocation14 + $0x48] sm:$0xff]  ;;  %p2658_p10 = scmp.ne.s32.totalorder (%p770_p2), %s1860_s12, %s2657_s0  ;;  %s2796_s16 = smov (%p770_p2), [#allocation17]  }
 0x1d7   : >> { %v2307_v7 = vpack.c.bf16 %v1193_v5, %v1192_v4  ;;  %v2322_v17 = vpack.c.bf16 %v1424_v13, %v1423_v12  ;;  %v1498_v19 = vld [vmem:[#allocation14 + $0x40] sm:$0xff]  ;;  %v1500_v24 = vld [vmem:[#allocation14 + $0x50] sm:$0xff]  ;;  %v1501_v25 = vld [vmem:[#allocation14 + $0x58] sm:$0xff]  ;;  %s2661_s11 = sshll.u32 (%p770_p2), %s2796_s16, 4  ;;  %s2662_s11 = int_to_ptr.vmem [resolvable:$false] %s2661_s11 }
 0x1d8   : >> { %v2094_v26 = vld [vmem:[%s3435_s9 + $0x8] sm:$0x7]  ;;  %v1651_v27 = vld [vmem:[#allocation15 + $0x40] sm:$0xff]  ;;  %p2659_p5 = pnand (%p770_p2), %p2658_p10, %p3498_p11  ;;  %p2664_p8 = scmp.lt.s32.totalorder (%p770_p2), %s1860_s12, %s2662_s11 }
 0x1d9   : >> { %2299 = vmatpush3.bf16.msra.mxu0 %v2298_v22  ;;  %v2325_v22 = vpack.c.bf16 %v1499_v20, %v1498_v19  ;;  %v2099_v62 = vld [vmem:[%s3495_s22 + $0x2] sm:$0x1]  ;;  %v1752_v13 = vld [vmem:[%s3496_s4] sm:$0x1]  ;;  %s3361_s20 = scalar_lea.hbm (%p770_p2), %s3497_s24, %s2105_s21  ;;  %s2663_s4 = scalar_lea.vmem (%p770_p2), %s2662_s11, 32 }
 0x1da   : >> { %2196 = vmatprep.subr.mxu0 %v2794_v21  ;;  %v2098_v1 = vld [vmem:[%s3436_s10 + $0x2] sm:$0x1]  ;;  %p2660_p7 = pneg (%p770_p2), %p2659_p5  ;;  %p2665_p6 = scmp.lt.s32.totalorder (%p770_p2), %s2663_s4, %s2657_s0 }
 0x1dc   : >> { %2184 = vmatmul.mubr.msk.f32.vlgmr.msra.gmra.mrb[0].mxu0 %vm688_vm3, %v3227_v23  ;;  %p2666_p12 = por (%p770_p2), %p2665_p6, %p2664_p8 }
 0x1dd   : >> { %2198 = vmatprep.mubr.msk.f32.mxu0 %vm2793_vm4, %v2794_v21  ;;  %2197 = vmatpush3.msk.msra.mxu0 %vm1043_vm6, %v1038_v49 }
 0x1de   : >> { %2300 = vmatprep.subr.bf16.mxu0 %v2792_v18  ;;  %p2667_p1 = pnand (%p770_p2), %p2666_p12, %p2660_p7 }
 0x1e0   : >> { %2199 = vmatmul.mubr.msk.f32.vlgmr.msra.gmra.mrb[2].mxu0 %vm1039_vm7, %v3251_v50 }
 0x1e1   : >> { %2209 = vmatprep.mubr.msk.f32.mxu0 %vm2793_vm4, %v2794_v21  ;;  %2302 = vmatpush3.bf16.msra.mxu0 %v2301_v53 }
 0x1e2   : >> { %2303 = vmatprep.subr.bf16.mxu0 %v2792_v18 }
 0x1e5   : >> { %2305 = vmatpush3.bf16.msra.mxu0 %v2304_v56 }
 0x1e6   : >> { %2306 = vmatprep.subr.bf16.mxu0 %v2792_v18 }
 0x24f   : >> { %v866_v38 = vpop.permute.xlu0 %865 }
 0x250   : >> { %v871_v39 = vrot.slane %v866_v38, %v857_v29 }
 0x2af   : >> { %v850_v30 = vpop.f32.mrb[0].mxu0 }
 0x2b0   : >> { %v851_v31 = vadd.f32 %v850_v30, %v780_v28  ;;  %v2185_v32 = vpop.f32.mrb[1].mxu0  ;;  %v1652_v28 = vld [vmem:[#allocation15 + $0x48] sm:$0xff] }
 0x2b1   : >> { %v2331_v30 = vpack.c.bf16 %v1652_v28, %v1651_v27  ;;  %v1654_v32 = vld [vmem:[#allocation15 + $0x58] sm:$0xff] }
 0x2b2   : >> { %v858_v34 = vrot.slane %v851_v31, %v857_v29  ;;  %v2328_v29 = vpack.c.bf16 %v1501_v25, %v1500_v24  ;;  %v1653_v31 = vld [vmem:[#allocation15 + $0x50] sm:$0xff] }
 0x2b4   : >> { %v859_v35 = vadd.f32 %v858_v34, %v854_v33  ;;  %v2334_v33 = vpack.c.bf16 %v1654_v32, %v1653_v31  ;;  %v1748_v34 = vld [vmem:[%s3439_s13] sm:$0xff] }
 0x2b6   : >> { %2469 = vtanh.f32 %v859_v35  ;;  %v1749_v35 = vld [vmem:[%s3439_s13 + $0x8] sm:$0xff] }
 0x2c0   : >> { %v2470_v36 = vpop.eup %2469 }
 0x2c1   : >> { %2187 = vmatpush3.xpose.msk.msra.mxu1 %vm688_vm3, %v2470_v36  ;;  %v1750_v36 = vld [vmem:[%s3439_s13 + $0x10] sm:$0xff] }
 0x2c2   : >> { %2191 = vmatprep.subr.mxu1 %v2794_v21 }
 0x2c4   : >> { %2189 = vmatmul.mubr.msk.f32.vlgmr.msra.gmra.mrb[0].mxu1 %vm688_vm3, %v861_v37  ;;  %v2337_v37 = vpack.c.bf16 %v1749_v35, %v1748_v34 }
 0x2c5   : >> { %2192 = vmatpush3.msra.mxu1 %v3190_v10  ;;  %2193 = vmatprep.mubr.msk.f32.mxu1 %vm2793_vm4, %v2794_v21 }
 0x2c6   : >> { %2223 = vmatprep.subr.mxu1 %v2794_v21 }
 0x397   : >> { %v944_v40 = vpop.f32.mrb[0].mxu1 }
 0x398   : >> { %v945_v41 = vadd.f32 %v944_v40, %v871_v39  ;;  %v2190_v42 = vpop.f32.mrb[1].mxu1  ;;  %v1190_v39 = vld [vmem:[%s3436_s10] sm:$0x1] }
 0x399   : >> { %v1196_v40 = vld [vmem:[%s3495_s22] sm:$0x1]  ;;  %v2091_v42 = vld [vmem:[%s3436_s10 + $0x1] sm:$0x1] }
 0x39a   : >> { %v949_v43 = vsel %vm948_vm5, %v945_v41, -inf }
 0x39b   : >> { %950 = vmax.xlane.f32.xlu0 %v949_v43  ;;  %v2092_v43 = vld [vmem:[%s3495_s22 + $0x1] sm:$0x1] }
 0x428   : >> { %v951_v44 = vpop.xlane.xlu0 %950 }
 0x429   : >> { %v952_v45 = vsub.f32 %v945_v41, %v951_v44  ;;  %v2342_v41 = vadd.f32 %v1196_v40, %v1190_v39 }
 0x42b   : >> { %v953_v46 = vmul.f32 1.442695, %v952_v45  ;;  %v2344_v45 = vadd.f32 %v2092_v43, %v2091_v42 }
 0x42d   : >> { %2471 = vpow2.f32 %v953_v46 }
 0x437   : >> { %v2472_v47 = vpop.eup %2471 }
 0x438   : >> { %v955_v48 = vsel %vm948_vm5, %v2472_v47, 0.0 }
 0x439   : >> { %956 = vadd.xlane.f32.xlu1 %v955_v48 }
 0x4c6   : >> { %v957_v57 = vpop.xlane.xlu1 %956 }
 0x4c7   : >> { %2473 = vrcp.f32 %v957_v57 }
 0x4d1   : >> { %v2474_v58 = vpop.eup %2473 }
 0x4d2   : >> { %v959_v59 = vmul.f32 %v2474_v58, %v2472_v47 }
 0x4d4   : >> { %2194 = vmatmul.mubr.msk.f32.vlgmr.msra.gmra.mrb[2].mxu1 %vm960_vm8, %v959_v59  ;;  %1829 = vst.msk [vmem:[%s1828_s18] sm:$0x1] %vm948_vm5, %v959_v59 }
 0x4d5   : >> { %2224 = vmatpush3.msk.msra.mxu1 %vm1043_vm6, %v2087_v60  ;;  %2225 = vmatprep.mubr.msk.f32.mxu1 %vm2793_vm4, %v2794_v21 }
 0x4d6   : >> { %2312 = vmatprep.subr.bf16.mxu1 %v2792_v18 }
 0x4d8   : >> { %2226 = vmatmul.mubr.msk.f32.vlgmr.msra.gmra.mrb[4].mxu1 %vm1039_vm7, %v3251_v50 }
 0x4d9   : >> { %2314 = vmatpush3.bf16.msra.mxu1 %v2313_v63  ;;  %2236 = vmatprep.mubr.msk.f32.mxu1 %vm2793_vm4, %v2794_v21 }
 0x4da   : >> { %2315 = vmatprep.subr.bf16.mxu1 %v2792_v18 }
 0x4dd   : >> { %2317 = vmatpush3.bf16.msra.mxu1 %v2316_v2 }
 0x4de   : >> { %2318 = vmatprep.subr.bf16.mxu1 %v2792_v18 }
 0x5a7   : >> { %v1030_v14 = vpop.f32.mrb[2].mxu1 }
 0x5a8   : >> { %v2195_v15 = vpop.f32.mrb[3].mxu1  ;;  %2210 = vmatmul.mubr.msk.f32.vlgmr.msra.gmra.mrb[2].mxu0 %vm688_vm3, %v1030_v14  ;;  %2237 = vmatmul.mubr.msk.f32.vlgmr.msra.gmra.mrb[4].mxu1 %vm688_vm3, %v1030_v14 }
 0x5a9   : >> { %2308 = vmatpush3.bf16.msra.mxu0 %v2307_v7  ;;  %2320 = vmatpush3.bf16.msra.mxu1 %v2319_v8 }
 0x5aa   : >> { %2309 = vmatprep.subr.bf16.mxu0 %v2792_v18  ;;  %2321 = vmatprep.subr.bf16.mxu1 %v2792_v18 }
 0x5ab   : >> { %2220 = vmatprep.mubr.msk.f32.mxu0 %vm2793_vm4, %v2794_v21  ;;  %2247 = vmatprep.mubr.msk.f32.mxu1 %vm2793_vm4, %v2794_v21 }
 0x5ad   : >> { %2311 = vmatpush3.bf16.msra.mxu0 %v2310_v16  ;;  %2323 = vmatpush3.bf16.msra.mxu1 %v2322_v17 }
 0x5ae   : >> { %2324 = vmatprep.subr.bf16.mxu1 %v2792_v18  ;;  %2250 = vmatprep.subr.mxu0 %v2794_v21 }
 0x5b0   : >> { %2221 = vmatmul.mubr.msk.f32.vlgmr.msra.gmra.mrb[2].mxu0 %vm688_vm3, %v3227_v23  ;;  %2248 = vmatmul.mubr.msk.f32.vlgmr.msra.gmra.mrb[4].mxu1 %vm688_vm3, %v3227_v23 }
 0x5b1   : >> { %2326 = vmatpush3.bf16.msra.mxu1 %v2325_v22  ;;  %2251 = vmatpush3.msk.msra.mxu0 %vm1043_vm6, %v2094_v26 }
 0x5b2   : >> { %2327 = vmatprep.subr.bf16.mxu1 %v2792_v18  ;;  %2252 = vmatprep.mubr.msk.f32.mxu0 %vm2793_vm4, %v2794_v21 }
 0x5b3   : >> { %2263 = vmatprep.mubr.msk.f32.mxu1 %vm2793_vm4, %v2794_v21  ;;  %2330 = vmatprep.subr.bf16.mxu0 %v2792_v18 }
 0x5b4   : >> { %2253 = vmatmul.mubr.msk.f32.vlgmr.msra.gmra.mrb[4].mxu0 %vm1039_vm7, %v3251_v50 }
 0x5b5   : >> { %2329 = vmatpush3.bf16.msra.mxu1 %v2328_v29  ;;  %2332 = vmatpush3.bf16.msra.mxu0 %v2331_v30 }
 0x5b6   : >> { %2333 = vmatprep.subr.bf16.mxu0 %v2792_v18  ;;  %2274 = vmatprep.mubr.msk.f32.mxu0 %vm2793_vm4, %v2794_v21 }
 0x5b7   : >> { %2336 = vmatprep.subr.bf16.mxu1 %v2792_v18 }
 0x5b8   : >> { %2264 = vmatmul.mubr.msk.f32.vlgmr.msra.gmra.mrb[6].mxu1 %vm688_vm3, %v1030_v14 }
 0x5b9   : >> { %2335 = vmatpush3.bf16.msra.mxu0 %v2334_v33  ;;  %2285 = vmatprep.mubr.msk.f32.mxu1 %vm2793_vm4, %v2794_v21  ;;  %v1751_v21 = vld [vmem:[%s3439_s13 + $0x18] sm:$0xff] }
 0x5ba   : >> { %2338 = vmatpush3.bf16.msra.mxu1 %v2337_v37  ;;  %v2340_v38 = vpack.c.bf16 %v1751_v21, %v1750_v36 }
 0x5bb   : >> { %2339 = vmatprep.subr.bf16.mxu1 %v2792_v18 }
 0x5bc   : >> { %2275 = vmatmul.mubr.msk.f32.vlgmr.msra.gmra.mrb[6].mxu0 %vm688_vm3, %v3227_v23 }
 0x5be   : >> { %2341 = vmatpush3.bf16.msra.mxu1 %v2340_v38 }
 0x683   : >> { %v1263_v44 = vpop.f32.mrb[2].mxu0  ;;  %v1493_v18 = vpop.f32.mrb[4].mxu1 }
 0x684   : >> { %v2343_v46 = vadd.f32 %v2342_v41, %v1263_v44  ;;  %v2222_v47 = vpop.f32.mrb[3].mxu0  ;;  %v2249_v48 = vpop.f32.mrb[5].mxu1  ;;  %v2345_v50 = vadd.f32 %v2344_v45, %v1493_v18 }
 0x686   : >> { %v2101_v49 = vmul.f32 -1.442695, %v2343_v46  ;;  %v2102_v53 = vmul.f32 -1.442695, %v2345_v50 }
 0x687   : >> { %v1573_v51 = vpop.f32.mrb[4].mxu0 }
 0x688   : >> { %2475 = vpow2.f32 %v2101_v49  ;;  %v2254_v52 = vpop.f32.mrb[5].mxu0 }
 0x689   : >> { %2477 = vpow2.f32 %v2102_v53 }
 0x68b   : >> { %v1643_v54 = vpop.f32.mrb[6].mxu1 }
 0x68c   : >> { %v1644_v55 = vadd.f32 %v1643_v54, %v1573_v51  ;;  %v2265_v56 = vpop.f32.mrb[7].mxu1 }
 0x68e   : >> { %v1649_v3 = vadd.f32 %v2098_v1, %v1644_v55 }
 0x68f   : >> { %v1723_v57 = vpop.f32.mrb[6].mxu0 }
 0x690   : >> { %v2276_v58 = vpop.f32.mrb[7].mxu0  ;;  %v1724_v0 = vadd.f32 %v2099_v62, %v1723_v57 }
 0x692   : >> { %v2476_v59 = vpop.eup %2475 }
 0x693   : >> { %v1731_v60 = vadd.f32 1.0, %v2476_v59  ;;  %v2478_v61 = vpop.eup %2477 }
 0x694   : >> { %v1738_v63 = vadd.f32 1.0, %v2478_v61 }
 0x695   : >> { %2479 = vrcp.f32 %v1731_v60 }
 0x696   : >> { %2481 = vrcp.f32 %v1738_v63 }
 0x69f   : >> { %v2480_v2 = vpop.eup %2479 }
 0x6a0   : >> { %v1741_v4 = vmul.f32 %v2480_v2, %v1724_v0  ;;  %v2482_v6 = vpop.eup %2481 }
 0x6a1   : >> { %v1744_v7 = vsub.f32 1.0, %v2482_v6  ;;  %v1746_v11 = vmul.f32 %v2482_v6, %v3227_v23 }
 0x6a2   : >> { %v1742_v5 = vadd.f32 %v1741_v4, %v1649_v3 }
 0x6a4   : >> { %2483 = vtanh.f32 %v1742_v5 }
 0x6ae   : >> { %v2484_v8 = vpop.eup %2483 }
 0x6af   : >> { %v1745_v9 = vmul.f32 %v2484_v8, %v1744_v7 }
 0x6b1   : >> { %v1747_v12 = vadd.f32 %v1746_v11, %v1745_v9 }
 0x6b3   : >> { %2286 = vmatmul.mubr.msk.f32.vlgmr.msra.gmra.mrb[8].mxu1 %vm688_vm3, %v1747_v12  ;;  %1830 = vst.msk [vmem:[#allocation2] sm:$0x1] %vm764_vm2, %v1747_v12 }
 0x6ba   : > { %v1832_v23 = vld [vmem:[#allocation2] sm:$0x1] (%p770_p2) }
 0x6bb   : > { %1833 = vst.msk [vmem:[%s664_s23] sm:$0x1] (%p770_p2), %vm764_vm2, %v1832_v23 }
 0x783   : > { %772 = sbr.rel (!%p770_p2) target bundleno = 460 (0x1cc), region = 202 }
 0x786   : >> { %v1822_v14 = vpop.f32.mrb[8].mxu1 }
 0x787   : >> { %v1823_v15 = vadd.f32 %v1822_v14, %v1752_v13  ;;  %v2287_v16 = vpop.f32.mrb[9].mxu1 }
 0x789   : >> { %1827 = vst.msk [vmem:[%s1826_s1] sm:$0x1] %vm766_vm0, %v1823_v15  ;;  %1831 = vst.msk [vmem:[#allocation3] sm:$0x1] %vm766_vm0, %v1823_v15 }
 0x78a   : > { %2670 = shalt.err (!%p2667_p1)
}
 0x78b   : > { %s2671_s23 = scalar_lea.hbm %s3361_s20, 16  ;;  %s2675_s3 = scalar_lea.hbm %s3497_s24, 32 }
 0x78c   : > { %p2672_p9 = scmp.ne.s32.totalorder %s3361_s20, %s2671_s23  ;;  %p2676_p13 = scmp.lt.u32.totalorder %s3361_s20, %s3497_s24 }
 0x78d   : > { %p2677_p0 = scmp.lt.u32.totalorder %s2675_s3, %s2671_s23  ;;  %p2679_p10 = scmp.lt.u32.totalorder %s2671_s23, %s3361_s20 }
 0x78e   : > { %p2673_p4 = pnand %p2672_p9, %p3498_p11 }
 0x78f   : > { %p2678_p2 = por %p2677_p0, %p2676_p13 }
 0x790   : > { %p2674_p3 = pneg %p2673_p4 }
 0x791   : > { %p2680_p5 = por %p2679_p10, %p2678_p2 }
 0x793   : > { %p2681_p7 = pnand %p2680_p5, %p2674_p3 }
 0x795   : > { %2684 = shalt.err (!%p2681_p7)
}
 0x796   : > { %2374 = dma.vmem_to_hbm [thread:$0]  (%p3498_p11), %s1860_s12, 16, %s3361_s20, %s1839_s14  }
 0x797   : > { %s2106_s0 = sshll.u32 %s2912_s30, 7  ;;  %s1872_s11 = sshll.u32 %s3201_s8, 4  ;;  %s1873_s11 = int_to_ptr.vmem [resolvable:$true] %s1872_s11 }
 0x798   : > { %s3499_s21 = sld [smem:[#allocation40_spill]]  ;;  %s1843_s23 = scalar_lea.sflag [#allocation19], %s3150_s28 }
 0x799   : > { %s2685_s3 = scalar_lea.vmem %s1873_s11, 128  ;;  %s2797_s16 = smov [#allocation18]  }
 0x79a   : > { %p2686_p8 = scmp.ne.s32.totalorder %s1873_s11, %s2685_s3  ;;  %s2689_s2 = sshll.u32 %s2797_s16, 4  ;;  %s2690_s2 = int_to_ptr.vmem [resolvable:$false] %s2689_s2 }
 0x79b   : > { %s2691_s5 = scalar_lea.vmem %s2690_s2, 256  ;;  %p2692_p1 = scmp.lt.s32.totalorder %s1873_s11, %s2690_s2 }
 0x79c   : > { %p2687_p6 = pnand %p2686_p8, %p3498_p11  ;;  %p2693_p9 = scmp.lt.s32.totalorder %s2691_s5, %s2685_s3 }
 0x79e   : > { %s3388_s18 = scalar_lea.hbm %s3499_s21, %s2106_s0  ;;  %p2688_p12 = pneg %p2687_p6 }
 0x79f   : > { %p2694_p4 = por %p2693_p9, %p2692_p1 }
 0x7a1   : > { %p2695_p3 = pnand %p2694_p4, %p2688_p12 }
 0x7a3   : > { %2698 = shalt.err (!%p2695_p3)
}
 0x7a4   : > { %s2699_s30 = scalar_lea.hbm %s3388_s18, 128  ;;  %s2703_s20 = scalar_lea.hbm %s3499_s21, 256 }
 0x7a5   : > { %p2700_p13 = scmp.ne.s32.totalorder %s3388_s18, %s2699_s30  ;;  %p2704_p10 = scmp.lt.u32.totalorder %s3388_s18, %s3499_s21 }
 0x7a6   : > { %p2705_p5 = scmp.lt.u32.totalorder %s2703_s20, %s2699_s30  ;;  %p2707_p8 = scmp.lt.u32.totalorder %s2699_s30, %s3388_s18 }
 0x7a7   : > { %p2701_p0 = pnand %p2700_p13, %p3498_p11 }
 0x7a8   : > { %p2706_p7 = por %p2705_p5, %p2704_p10 }
 0x7a9   : > { %p2702_p2 = pneg %p2701_p0 }
 0x7aa   : > { %p2708_p6 = por %p2707_p8, %p2706_p7 }
 0x7ac   : > { %p2709_p12 = pnand %p2708_p6, %p2702_p2 }
 0x7ae   : > { %2712 = shalt.err (!%p2709_p12)
}
 0x7af   : > { %2375 = dma.vmem_to_hbm [thread:$0]  (%p3498_p11), %s1873_s11, 128, %s3388_s18, %s1843_s23  }
 0x7b0 PF: > { %s1891_s5 = sand.u32 1, %s2763_s26   ;;  %p3500_p1 = scmp.ne.s32.totalorder %s3480_s17, 0 }
 0x7b1   : > { %p3501_p9 = scmp.ge.s32.totalorder %s2775_s29, 2  ;;  %s1892_s14 = scalar_lea.sflag [#allocation8], %s1891_s5 }
 0x7b3   : > { %p2399_p4 = pnand %p3501_p9, %p3500_p1 }
 0x7b5   : > { %2754 = dma.done.wait (!%p2399_p4), %s1892_s14, 16  }
 0x7b6   : > { %2756 = vsyncadd (!%p2399_p4), %s1892_s14, 4294967280  ;;  %s1900_s0 = scalar_lea.sflag [#allocation19], %s1891_s5 }
 0x7b7   : > { %2758 = dma.done.wait (!%p2399_p4), %s1900_s0, 128  }
 0x7b8   : > { %2760 = vsyncadd (!%p2399_p4), %s1900_s0, 4294967168  ;;  %s3502_s4 = sld [smem:[#allocation27_spill]]  ;;  %s3503_s28 = sld [smem:[#allocation28_spill]] }
 0x7b9   : > { %p41_p11 = scmp.ge.s32.totalorder %s3041_s19, 4   ;;  %s3504_s26 = smov %s2767_s27 }
 0x7ba   : > { %s3506_s29 = smov %s3041_s19 }
 0x7bb   :  { %43 = sbr.rel (!%p41_p11) target bundleno = 24 (0x18), region = 213 }
 0x7be   : > { %s3505_s27 = smov %s3502_s4 }
 0x7c2   :  { %1905 = vsyncpa [#allocation7], 1 }
 0x7c3   :  { %1907 = vsyncpa [#allocation7 + $0x1], 1 }
 0x7c4   :  { %1908 = vsyncpa [#allocation10], 1 }
 0x7c5   :  { %1910 = vsyncpa [#allocation10 + $0x1], 1 }
 0x7c6   :  { %1911 = vsyncpa [#allocation13], 1 }
 0x7c7   :  { %1912 = vsyncpa [#allocation16], 1 }
 0x7c8   :  { %1913 = vsyncpa [#allocation8], 1 }
 0x7c9   :  { %1915 = vsyncpa [#allocation8 + $0x1], 1 }
 0x7ca   :  { %1916 = vsyncpa [#allocation19], 1 }
 0x7cb   :  { %1918 = vsyncpa [#allocation19 + $0x1], 1 }

</bundles_post_ra>
